<compile_context>
chip_gen: v7x
topology: tpu7x:2x2x1
jax: 0.10.0
libtpu: 0.0.40
codegen_flags: <defaults>
</compile_context>

<pallas_src>
import functools

import jax
import jax.numpy as jnp
from jax.experimental import pallas as pl
from jax.experimental.pallas import tpu as pltpu


def _round_up(x, m):
    return ((x + m - 1) // m) * m


def decoder_kernel(z_ref, w1_ref, w2_ref, w3_ref, w4_ref, b_ref, o_ref,
                   *, d1, d2, d3, d4):
    """Four fused MXU matmuls (f32 accumulation) + VPU/EUP activations, all in VMEM.

    b_ref holds the four bias rows concatenated on the lane dim
    ([0:d1]->b1, [d1:d1+d2]->b2, ...); d1..d3 and d4 are 128-multiples, so every
    static bias slice is lane-aligned.
    """
    cdt = w1_ref.dtype                       # MXU-input dtype (bf16 after prepare_params)
    o2, o3, o4 = d1, d1 + d2, d1 + d2 + d3

    z = z_ref[...].astype(cdt)

    h = jnp.dot(z, w1_ref[...], preferred_element_type=jnp.float32)
    h = jnp.maximum(h + b_ref[:, 0:d1], 0.0)                                 # ReLU

    h = jnp.dot(h.astype(cdt), w2_ref[...], preferred_element_type=jnp.float32)
    h = h + b_ref[:, o2:o2 + d2]
    h = 0.5 * jnp.tanh(0.5 * h) + 0.5        # sigmoid: single EUP push, exact

    h = jnp.dot(h.astype(cdt), w3_ref[...], preferred_element_type=jnp.float32)
    h = jnp.maximum(h + b_ref[:, o3:o3 + d3], 0.0)                           # ReLU

    h = jnp.dot(h.astype(cdt), w4_ref[...], preferred_element_type=jnp.float32)
    h = h + b_ref[:, o4:o4 + d4]

    o_ref[...] = h.astype(o_ref.dtype)


def _largest_divisor_tile(bp, cap):
    """Largest multiple-of-8 divisor of bp that is <= cap (bp is a multiple of 8)."""
    t = min(cap, bp)
    t -= t % 8
    while t >= 8:
        if bp % t == 0:
            return t
        t -= 8
    return 8


def _auto_tb(batch, k_in, out_pad, wbytes):
    """Pick a batch tile that:
      * is a multiple of 8 sublanes and divides the 8-rounded batch (no wrapper
        pad/slice copy except a <=7-row ragged tail),
      * v7x (2 TCs): gives >= 4 grid steps so both cores work and still pipeline,
      * v5e/v6e (1 TC): collapses to a single step when the whole problem fits
        the VMEM budget (extra steps on one core are pure fixed overhead),
        otherwise caps at 1024 rows.
    Returns (tb, padded_batch)."""
    bp = _round_up(batch, 8)
    try:
        kind = jax.devices()[0].device_kind.lower()
    except Exception:                                  # pragma: no cover
        kind = ""
    two_tc = "v7" in kind                              # v7x: 2 TensorCores per chip

    # Per-step VMEM: double-buffered z + out tiles (z lane-padded to 128) + weights.
    # Keep under ~12 MiB: below the 16 MiB (v5e) / 32 MiB (v6e, v7x) scoped default.
    kp = _round_up(k_in, 128)
    row_bytes = (kp + out_pad) * 4 * 2
    vmem_cap = max(8, ((12 << 20) - wbytes) // row_bytes // 8 * 8)

    if two_tc and bp >= 32:
        cap = min(2048, vmem_cap, bp // 4)             # >= 4 steps, 2 per core
        cap = max(8, cap - cap % 8)
        tb = _largest_divisor_tile(bp, cap)
    else:
        if bp <= vmem_cap:
            tb = bp                                    # single step, zero extra overhead
        else:
            cap = min(1024, vmem_cap)                  # v5e: 1 vst slot / smallest VMEM
            tb = _largest_divisor_tile(bp, max(8, cap - cap % 8))
    return tb, bp


def decoder_forward(z, params, *, out_dim=None, tb=None, out_dtype=jnp.float32):
    """z: (B, lay4) float32.  params: output of prepare_params() (padded, bf16 W,
    fused f32 bias).  out_dim: logical output width (padding columns are sliced
    off if it is not a 128-multiple).  out_dtype=jnp.bfloat16 halves output-store
    HBM bytes if downstream consumers tolerate it."""
    B, K = z.shape
    w1, w2, w3, w4, b_all = params["w1"], params["w2"], params["w3"], params["w4"], params["b"]
    d1, d2, d3, d4 = w1.shape[1], w2.shape[1], w3.shape[1], w4.shape[1]
    out_logical = d4 if out_dim is None else int(out_dim)
    # If a caller passes un-prepped f32 params the MXU runs in f32 (correct, slower).
    assert w2.dtype == w1.dtype and w3.dtype == w1.dtype and w4.dtype == w1.dtype

    wbytes = sum(int(a.size) * a.dtype.itemsize for a in (w1, w2, w3, w4, b_all))

    if tb is None:
        tb, Bp = _auto_tb(B, K, d4, wbytes)
    else:
        tb = max(8, min(_round_up(tb, 8), _round_up(B, 8)))
        Bp = _round_up(B, tb)

    if Bp != B:
        # Only hit for ragged batches (auto path pads <= 7 rows) or explicit tb;
        # the out[:B] slice below is a second HBM copy of the output, so the auto
        # path deliberately picks tb dividing the 8-rounded batch.
        z = jnp.pad(z, ((0, Bp - B), (0, 0)))
    grid = (Bp // tb,)

    # Weights/biases are tiny (~170 KiB): constant index map -> stay VMEM-resident.
    def rep(shape):
        return pl.BlockSpec(shape, lambda i: (0, 0))

    cost = pl.CostEstimate(
        flops=2 * Bp * (K * d1 + d1 * d2 + d2 * d3 + d3 * d4),
        transcendentals=Bp * d2,                       # one tanh per sigmoid element
        bytes_accessed=Bp * K * 4 + Bp * d4 * jnp.dtype(out_dtype).itemsize + wbytes,
    )

    kernel = functools.partial(decoder_kernel, d1=d1, d2=d2, d3=d3, d4=d4)

    out = pl.pallas_call(
        kernel,
        out_shape=jax.ShapeDtypeStruct((Bp, d4), out_dtype),
        grid_spec=pltpu.PrefetchScalarGridSpec(
            num_scalar_prefetch=0,
            grid=grid,
            in_specs=[
                pl.BlockSpec((tb, K), lambda i: (i, 0)),   # z tile over batch
                rep(w1.shape), rep(w2.shape), rep(w3.shape), rep(w4.shape),
                rep(b_all.shape),
            ],
            out_specs=pl.BlockSpec((tb, d4), lambda i: (i, 0)),
        ),
        compiler_params=pltpu.CompilerParams(
            # Parallel batch grid: shards steps across both v7x TensorCores and lets
            # BlockSpec double-buffering hide the z-load / out-store on every chip.
            dimension_semantics=("parallel",),
            # VMEM NOTE: scoped default is 16 MiB (v5e) / 32 MiB (v6e, v7x); v7x's
            # *physical* VMEM is 64 MiB (half of v5e/v6e), so headroom for raising
            # vmem_limit_bytes is smallest on v7x.  Per-step footprint is
            # 2*tb*(round_up(K,128)+d4)*4 B (z is lane-padded in VMEM) + weights;
            # _auto_tb keeps it under ~12 MiB, so no limit bump is needed here.
        ),
        cost_estimate=cost,
    )(z, w1, w2, w3, w4, b_all)

    if Bp != B:
        out = out[:B]
    if out_logical != d4:
        out = out[:, :out_logical]        # drop layer-4 lane-padding columns
    return out


def init_params(key, lay1, lay2, lay3, lay4, input_size, dtype=jnp.float32):
    """Deterministic init mimicking nn.Linear (uniform +/- 1/sqrt(fan_in)).
    Weights stored transposed: (in_features, out_features)."""
    keys = jax.random.split(key, 8)

    def linear(kw, kb, fan_in, fan_out):
        bound = 1.0 / jnp.sqrt(fan_in)
        w = jax.random.uniform(kw, (fan_in, fan_out), dtype, -bound, bound)
        b = jax.random.uniform(kb, (1, fan_out), dtype, -bound, bound)
        return w, b

    w1, b1 = linear(keys[0], keys[1], lay4, lay3)
    w2, b2 = linear(keys[2], keys[3], lay3, lay2)
    w3, b3 = linear(keys[4], keys[5], lay2, lay1)
    w4, b4 = linear(keys[6], keys[7], lay1, input_size)
    return dict(w1=w1, b1=b1, w2=w2, b2=b2, w3=w3, b3=b3, w4=w4, b4=b4)


def prepare_params(params, *, compute_dtype=jnp.bfloat16, lane=128):
    """One-time prep:
      * zero-pad every hidden dim AND the output dim to 128-lane multiples
        (lane-dense intermediates, unmasked output stores even if input_size is
        not a 128-multiple).  Pad-then-cast keeps the zeros exact in bf16, so
        results are unchanged (see header comment).
      * cast weights to the MXU-input dtype; biases stay f32 (added after f32
        accumulation) and are fused into one (1, p3+p2+p1+p_out) operand."""
    w1, b1 = params["w1"], params["b1"]
    w2, b2 = params["w2"], params["b2"]
    w3, b3 = params["w3"], params["b3"]
    w4, b4 = params["w4"], params["b4"]

    lay4, lay3 = w1.shape
    lay2, lay1, out_dim = w2.shape[1], w3.shape[1], w4.shape[1]
    p3, p2, p1, pout = (_round_up(d, lane) for d in (lay3, lay2, lay1, out_dim))

    def pad2(a, rows, cols):
        return jnp.pad(a, ((0, rows - a.shape[0]), (0, cols - a.shape[1])))

    b_all = jnp.concatenate(
        [pad2(b1, 1, p3), pad2(b2, 1, p2), pad2(b3, 1, p1), pad2(b4, 1, pout)],
        axis=1).astype(jnp.float32)

    return dict(
        w1=pad2(w1, lay4, p3).astype(compute_dtype),
        w2=pad2(w2, p3, p2).astype(compute_dtype),
        w3=pad2(w3, p2, p1).astype(compute_dtype),
        w4=pad2(w4, p1, pout).astype(compute_dtype),
        b=b_all,
    )


def decoder_reference(z, p):
    h = jnp.maximum(z @ p["w1"] + p["b1"], 0.0)
    h = jax.nn.sigmoid(h @ p["w2"] + p["b2"])
    h = jnp.maximum(h @ p["w3"] + p["b3"], 0.0)
    return h @ p["w4"] + p["b4"]


if __name__ == "__main__":
    # TODO(synk): input_size comes from torch.load('train_sig_data.pt').shape[2]
    # in the original script; use a fixed stand-in here.
    lay1, lay2, lay3, lay4 = 128, 64, 32, 16
    input_size = 256
    batch = 512     # auto tile: 1 grid step on v5e/v6e, 4 parallel steps on v7x

    key = jax.random.PRNGKey(0)
    kp, kz = jax.random.split(key)
    params = init_params(kp, lay1, lay2, lay3, lay4, input_size)   # logical f32 params
    prepped = prepare_params(params)           # pad + bf16 + bias fuse (done once)
    z = jax.random.normal(kz, (batch, lay4), jnp.float32)

    fwd = jax.jit(functools.partial(decoder_forward, out_dim=input_size,
                                    tb=None, out_dtype=jnp.float32))
    out = jax.block_until_ready(fwd(z, prepped))

    ref = decoder_reference(z, params)
    assert out.shape == (batch, input_size)
    rel_err = jnp.max(jnp.abs(out - ref)) / jnp.maximum(1.0, jnp.max(jnp.abs(ref)))
    assert rel_err < 5e-2, f"mismatch vs reference: rel err {rel_err}"

    print("KERNEL_OK")
</pallas_src>

<mosaic_0001>
module attributes {stable_mosaic.version = 11 : i64} {
  func.func @decoder_kernel(%arg0: i32, %arg1: memref<512x16xf32, #tpu.memory_space<vmem>>, %arg2: memref<16x128xbf16, #tpu.memory_space<vmem>>, %arg3: memref<128x128xbf16, #tpu.memory_space<vmem>>, %arg4: memref<128x128xbf16, #tpu.memory_space<vmem>>, %arg5: memref<128x256xbf16, #tpu.memory_space<vmem>>, %arg6: memref<1x640xf32, #tpu.memory_space<vmem>>, %arg7: memref<512x256xf32, #tpu.memory_space<vmem>>) attributes {dimension_semantics = [#tpu.dimension_semantics<parallel>], iteration_bounds = array<i64: 1>, scalar_prefetch = 0 : i64, scratch_operands = 0 : i64, tpu.core_type = #tpu.core_type<tc>, window_params = [{transform_indices = @transform_0, window_bounds = array<i64: 512, 16>}, {pipeline_mode = #tpu.pipeline_mode<synchronous>, transform_indices = @transform_1, window_bounds = array<i64: 16, 128>}, {pipeline_mode = #tpu.pipeline_mode<synchronous>, transform_indices = @transform_2, window_bounds = array<i64: 128, 128>}, {pipeline_mode = #tpu.pipeline_mode<synchronous>, transform_indices = @transform_3, window_bounds = array<i64: 128, 128>}, {pipeline_mode = #tpu.pipeline_mode<synchronous>, transform_indices = @transform_4, window_bounds = array<i64: 128, 256>}, {pipeline_mode = #tpu.pipeline_mode<synchronous>, transform_indices = @transform_5, window_bounds = array<i64: 1, 640>}, {transform_indices = @transform_6, window_bounds = array<i64: 512, 256>}]} {
    %c0 = arith.constant 0 : index
    %c0_0 = arith.constant 0 : index
    %0 = vector.load %arg1[%c0, %c0_0] : memref<512x16xf32, #tpu.memory_space<vmem>>, vector<512x16xf32>
    %1 = arith.truncf %0 : vector<512x16xf32> to vector<512x16xbf16>
    %c0_1 = arith.constant 0 : index
    %c0_2 = arith.constant 0 : index
    %2 = vector.load %arg2[%c0_1, %c0_2] : memref<16x128xbf16, #tpu.memory_space<vmem>>, vector<16x128xbf16>
    %cst = arith.constant dense<0.000000e+00> : vector<512x128xf32>
    %3 = tpu.matmul %1, %2, %cst {dimension_numbers = #tpu.dot_dimension_numbers<[1], [0], [0], [1], [0, 0, 1, 1], [], []>} : vector<512x16xbf16>, vector<16x128xbf16>, vector<512x128xf32> -> vector<512x128xf32>
    %c0_3 = arith.constant 0 : index
    %c0_4 = arith.constant 0 : index
    %4 = vector.load %arg6[%c0_3, %c0_4] : memref<1x640xf32, #tpu.memory_space<vmem>>, vector<1x128xf32>
    %5 = vector.broadcast %4 : vector<1x128xf32> to vector<512x128xf32>
    %6 = arith.addf %3, %5 : vector<512x128xf32>
    %cst_5 = arith.constant 0.000000e+00 : f32
    %7 = vector.broadcast %cst_5 : f32 to vector<512x128xf32>
    %8 = arith.maximumf %6, %7 : vector<512x128xf32>
    %9 = arith.truncf %8 : vector<512x128xf32> to vector<512x128xbf16>
    %c0_6 = arith.constant 0 : index
    %c0_7 = arith.constant 0 : index
    %10 = vector.load %arg3[%c0_6, %c0_7] : memref<128x128xbf16, #tpu.memory_space<vmem>>, vector<128x128xbf16>
    %cst_8 = arith.constant dense<0.000000e+00> : vector<512x128xf32>
    %11 = tpu.matmul %9, %10, %cst_8 {dimension_numbers = #tpu.dot_dimension_numbers<[1], [0], [0], [1], [0, 0, 1, 1], [], []>} : vector<512x128xbf16>, vector<128x128xbf16>, vector<512x128xf32> -> vector<512x128xf32>
    %c0_9 = arith.constant 0 : index
    %c128 = arith.constant 128 : index
    %12 = vector.load %arg6[%c0_9, %c128] : memref<1x640xf32, #tpu.memory_space<vmem>>, vector<1x128xf32>
    %13 = vector.broadcast %12 : vector<1x128xf32> to vector<512x128xf32>
    %14 = arith.addf %11, %13 : vector<512x128xf32>
    %cst_10 = arith.constant 5.000000e-01 : f32
    %15 = vector.broadcast %cst_10 : f32 to vector<512x128xf32>
    %16 = arith.mulf %15, %14 : vector<512x128xf32>
    %17 = math.tanh %16 : vector<512x128xf32>
    %cst_11 = arith.constant 5.000000e-01 : f32
    %18 = vector.broadcast %cst_11 : f32 to vector<512x128xf32>
    %19 = arith.mulf %18, %17 : vector<512x128xf32>
    %cst_12 = arith.constant 5.000000e-01 : f32
    %20 = vector.broadcast %cst_12 : f32 to vector<512x128xf32>
    %21 = arith.addf %19, %20 : vector<512x128xf32>
    %22 = arith.truncf %21 : vector<512x128xf32> to vector<512x128xbf16>
    %c0_13 = arith.constant 0 : index
    %c0_14 = arith.constant 0 : index
    %23 = vector.load %arg4[%c0_13, %c0_14] : memref<128x128xbf16, #tpu.memory_space<vmem>>, vector<128x128xbf16>
    %cst_15 = arith.constant dense<0.000000e+00> : vector<512x128xf32>
    %24 = tpu.matmul %22, %23, %cst_15 {dimension_numbers = #tpu.dot_dimension_numbers<[1], [0], [0], [1], [0, 0, 1, 1], [], []>} : vector<512x128xbf16>, vector<128x128xbf16>, vector<512x128xf32> -> vector<512x128xf32>
    %c0_16 = arith.constant 0 : index
    %c256 = arith.constant 256 : index
    %25 = vector.load %arg6[%c0_16, %c256] : memref<1x640xf32, #tpu.memory_space<vmem>>, vector<1x128xf32>
    %26 = vector.broadcast %25 : vector<1x128xf32> to vector<512x128xf32>
    %27 = arith.addf %24, %26 : vector<512x128xf32>
    %cst_17 = arith.constant 0.000000e+00 : f32
    %28 = vector.broadcast %cst_17 : f32 to vector<512x128xf32>
    %29 = arith.maximumf %27, %28 : vector<512x128xf32>
    %30 = arith.truncf %29 : vector<512x128xf32> to vector<512x128xbf16>
    %c0_18 = arith.constant 0 : index
    %c0_19 = arith.constant 0 : index
    %31 = vector.load %arg5[%c0_18, %c0_19] : memref<128x256xbf16, #tpu.memory_space<vmem>>, vector<128x256xbf16>
    %cst_20 = arith.constant dense<0.000000e+00> : vector<512x256xf32>
    %32 = tpu.matmul %30, %31, %cst_20 {dimension_numbers = #tpu.dot_dimension_numbers<[1], [0], [0], [1], [0, 0, 1, 1], [], []>} : vector<512x128xbf16>, vector<128x256xbf16>, vector<512x256xf32> -> vector<512x256xf32>
    %c0_21 = arith.constant 0 : index
    %c384 = arith.constant 384 : index
    %33 = vector.load %arg6[%c0_21, %c384] : memref<1x640xf32, #tpu.memory_space<vmem>>, vector<1x256xf32>
    %34 = vector.broadcast %33 : vector<1x256xf32> to vector<512x256xf32>
    %35 = arith.addf %32, %34 : vector<512x256xf32>
    %c0_22 = arith.constant 0 : index
    %c0_23 = arith.constant 0 : index
    %36 = vector.load %arg7[%c0_22, %c0_23] : memref<512x256xf32, #tpu.memory_space<vmem>>, vector<512x256xf32>
    tpu.vector_store %arg7[%c0_22, %c0_23], %35 {strides = array<i32>} : memref<512x256xf32, #tpu.memory_space<vmem>>, vector<512x256xf32>,
    return
  }
  func.func @transform_0(%arg0: i32) -> (i32, i32) {
    %c0_i32 = arith.constant 0 : i32
    %c0_i32_0 = arith.constant 0 : i32
    return %arg0, %c0_i32 : i32, i32
  }
  func.func @transform_1(%arg0: i32) -> (i32, i32) {
    %c0_i32 = arith.constant 0 : i32
    %c0_i32_0 = arith.constant 0 : i32
    %c0_i32_1 = arith.constant 0 : i32
    return %c0_i32, %c0_i32_0 : i32, i32
  }
  func.func @transform_2(%arg0: i32) -> (i32, i32) {
    %c0_i32 = arith.constant 0 : i32
    %c0_i32_0 = arith.constant 0 : i32
    %c0_i32_1 = arith.constant 0 : i32
    return %c0_i32, %c0_i32_0 : i32, i32
  }
  func.func @transform_3(%arg0: i32) -> (i32, i32) {
    %c0_i32 = arith.constant 0 : i32
    %c0_i32_0 = arith.constant 0 : i32
    %c0_i32_1 = arith.constant 0 : i32
    return %c0_i32, %c0_i32_0 : i32, i32
  }
  func.func @transform_4(%arg0: i32) -> (i32, i32) {
    %c0_i32 = arith.constant 0 : i32
    %c0_i32_0 = arith.constant 0 : i32
    %c0_i32_1 = arith.constant 0 : i32
    return %c0_i32, %c0_i32_0 : i32, i32
  }
  func.func @transform_5(%arg0: i32) -> (i32, i32) {
    %c0_i32 = arith.constant 0 : i32
    %c0_i32_0 = arith.constant 0 : i32
    %c0_i32_1 = arith.constant 0 : i32
    return %c0_i32, %c0_i32_0 : i32, i32
  }
  func.func @transform_6(%arg0: i32) -> (i32, i32) {
    %c0_i32 = arith.constant 0 : i32
    %c0_i32_0 = arith.constant 0 : i32
    return %arg0, %c0_i32 : i32, i32
  }
}

</mosaic_0001>

<bundles_post_ra>
// kernel: decoder_forward.1
= control target key start
LH: loop header
LB: loop body
LE: loop exit
PB: predicated region body
PF: predicated region fallthrough
CT: control target
= control target key end

     0   :  { %vm136_vm0 = vcmask 130048   ;;  %s3767_s0 = inlined_call_operand.vmem [shape: f32[512,16], index: 0, kind: input, shape index: {}]   ;;  %s3768_s1 = inlined_call_operand.vmem [shape: bf16[16,128], index: 1, kind: input, shape index: {}]   ;;  %s3769_s2 = inlined_call_operand.vmem [shape: bf16[128,128], index: 2, kind: input, shape index: {}]   ;;  %s3770_s3 = inlined_call_operand.vmem [shape: bf16[128,128], index: 3, kind: input, shape index: {}]   ;;  %s3771_s4 = inlined_call_operand.vmem [shape: bf16[128,256], index: 4, kind: input, shape index: {}]   ;;  %s3772_s5 = inlined_call_operand.vmem [shape: f32[1,640], index: 5, kind: input, shape index: {}]   ;;  %s3773_s6 = inlined_call_operand.hbm [shape: f32[512,256], index: 6, kind: output, shape index: {}]  }
   0x1   :  { %v2754_v0 = vld [vmem:[%s3768_s1] sm:$0xff]   ;;  %v26_v2 = vld [vmem:[%s3767_s0 + $0x8] sm:$0xff]  ;;  %v27_v3 = vld [vmem:[%s3767_s0 + $0x10] sm:$0xff] }
   0x2   :  { %v25_v1 = vld [vmem:[%s3767_s0] sm:$0xff]  ;;  %2508 = vmatprep.subr.bf16.mxu0 %v2754_v0  ;;  %v28_v5 = vld [vmem:[%s3767_s0 + $0x18] sm:$0xff]  ;;  %v30_v7 = vld [vmem:[%s3767_s0 + $0x28] sm:$0xff] }
   0x3   :  { %v89_v4 = vpack.c.bf16 %v26_v2, %v25_v1  ;;  %v29_v6 = vld [vmem:[%s3767_s0 + $0x20] sm:$0xff]  ;;  %2509 = vmatpush3.bf16.msra.mxu0 %v2754_v0  ;;  %v90_v8 = vpack.c.bf16 %v28_v5, %v27_v3  ;;  %v31_v10 = vld [vmem:[%s3767_s0 + $0x30] sm:$0xff]  ;;  %v32_v11 = vld [vmem:[%s3767_s0 + $0x38] sm:$0xff] }
   0x4   :  { %v91_v9 = vpack.c.bf16 %v30_v7, %v29_v6  ;;  %v33_v12 = vld [vmem:[%s3767_s0 + $0x40] sm:$0xff]  ;;  %v34_v13 = vld [vmem:[%s3767_s0 + $0x48] sm:$0xff]  ;;  %v92_v14 = vpack.c.bf16 %v32_v11, %v31_v10  ;;  %v35_v18 = vld [vmem:[%s3767_s0 + $0x50] sm:$0xff] }
   0x5   :  { %2510 = vmatprep.mubr.msk.bf16.mxu0 %vm136_vm0, %v89_v4  ;;  %v93_v15 = vpack.c.bf16 %v34_v13, %v33_v12  ;;  %v2755_v16 = vld [vmem:[%s3769_s2] sm:$0xff]   ;;  %v2756_v17 = vld [vmem:[%s3769_s2 + $0x8] sm:$0xff]   ;;  %v36_v19 = vld [vmem:[%s3767_s0 + $0x58] sm:$0xff] }
   0x6   :  { %2511 = vmatmul.mubr.msk.bf16.vlgmr.msra.gmra.mrb[0].mxu0 %vm136_vm0, %v90_v8  ;;  %2574 = vmatprep.subr.bf16.mxu0 %v2755_v16  ;;  %v37_v20 = vld [vmem:[%s3767_s0 + $0x60] sm:$0xff]  ;;  %v38_v21 = vld [vmem:[%s3767_s0 + $0x68] sm:$0xff]  ;;  %v2757_v22 = vld [vmem:[%s3769_s2 + $0x10] sm:$0xff]   ;;  %v94_v23 = vpack.c.bf16 %v36_v19, %v35_v18 }
   0x7   :  { %2514 = vmatprep.mubr.msk.bf16.mxu0 %vm136_vm0, %v91_v9  ;;  %2734 = vmatprep.subr.bf16.mxu1 %v2755_v16  ;;  %v95_v24 = vpack.c.bf16 %v38_v21, %v37_v20  ;;  %v2758_v25 = vld [vmem:[%s3769_s2 + $0x18] sm:$0xff]   ;;  %v39_v26 = vld [vmem:[%s3767_s0 + $0x70] sm:$0xff]  ;;  %v41_v28 = vld [vmem:[%s3767_s0 + $0x80] sm:$0xff] }
   0x8   :  { %2742 = vmatpush3.bf16.msra.mxu1 %v2755_v16  ;;  %2575 = vmatpush3.bf16.msra.mxu0 %v2755_v16  ;;  %v40_v27 = vld [vmem:[%s3767_s0 + $0x78] sm:$0xff]  ;;  %v42_v29 = vld [vmem:[%s3767_s0 + $0x88] sm:$0xff]  ;;  %v2759_v30 = vld [vmem:[%s3769_s2 + $0x20] sm:$0xff]  }
   0x9   :  { %2576 = vmatprep.subr.bf16.mxu0 %v2756_v17  ;;  %2735 = vmatprep.subr.bf16.mxu1 %v2756_v17  ;;  %v96_v31 = vpack.c.bf16 %v40_v27, %v39_v26  ;;  %v97_v32 = vpack.c.bf16 %v42_v29, %v41_v28  ;;  %v2760_v33 = vld [vmem:[%s3769_s2 + $0x28] sm:$0xff]   ;;  %v43_v34 = vld [vmem:[%s3767_s0 + $0x90] sm:$0xff]  ;;  %v44_v35 = vld [vmem:[%s3767_s0 + $0x98] sm:$0xff] }
   0xa   :  { %v45_v36 = vld [vmem:[%s3767_s0 + $0xa0] sm:$0xff]  ;;  %v46_v37 = vld [vmem:[%s3767_s0 + $0xa8] sm:$0xff]  ;;  %v2761_v38 = vld [vmem:[%s3769_s2 + $0x30] sm:$0xff]   ;;  %v98_v39 = vpack.c.bf16 %v44_v35, %v43_v34 }
   0xb   :  { %v2762_v40 = vld [vmem:[%s3769_s2 + $0x38] sm:$0xff]   ;;  %v99_v41 = vpack.c.bf16 %v46_v37, %v45_v36  ;;  %v47_v42 = vld [vmem:[%s3767_s0 + $0xb0] sm:$0xff]  ;;  %v49_v44 = vld [vmem:[%s3767_s0 + $0xc0] sm:$0xff] }
   0xc   :  { %2743 = vmatpush3.bf16.msra.mxu1 %v2756_v17  ;;  %2577 = vmatpush3.bf16.msra.mxu0 %v2756_v17  ;;  %v48_v43 = vld [vmem:[%s3767_s0 + $0xb8] sm:$0xff]  ;;  %v50_v45 = vld [vmem:[%s3767_s0 + $0xc8] sm:$0xff] }
   0xd   :  { %2736 = vmatprep.subr.bf16.mxu1 %v2757_v22  ;;  %2578 = vmatprep.subr.bf16.mxu0 %v2757_v22 }
   0xe   :  { %2515 = vmatmul.mubr.msk.bf16.gmra.mrb[4].mxu0 %vm136_vm0, %v92_v14 }
   0xf   :  { %2518 = vmatprep.mubr.msk.bf16.mxu0 %vm136_vm0, %v93_v15 }
  0x10   :  { %2744 = vmatpush3.bf16.msra.mxu1 %v2757_v22  ;;  %2579 = vmatpush3.bf16.msra.mxu0 %v2757_v22 }
  0x11   :  { %2580 = vmatprep.subr.bf16.mxu0 %v2758_v25  ;;  %2737 = vmatprep.subr.bf16.mxu1 %v2758_v25 }
  0x14   :  { %2745 = vmatpush3.bf16.msra.mxu1 %v2758_v25  ;;  %2581 = vmatpush3.bf16.msra.mxu0 %v2758_v25 }
  0x15   :  { %2738 = vmatprep.subr.bf16.mxu1 %v2759_v30  ;;  %2582 = vmatprep.subr.bf16.mxu0 %v2759_v30 }
  0x16   :  { %2519 = vmatmul.mubr.msk.bf16.gmra.mrb[8].mxu0 %vm136_vm0, %v94_v23 }
  0x17   :  { %2522 = vmatprep.mubr.msk.bf16.mxu0 %vm136_vm0, %v95_v24 }
  0x18   :  { %2746 = vmatpush3.bf16.msra.mxu1 %v2759_v30  ;;  %2583 = vmatpush3.bf16.msra.mxu0 %v2759_v30 }
  0x19   :  { %2584 = vmatprep.subr.bf16.mxu0 %v2760_v33  ;;  %2739 = vmatprep.subr.bf16.mxu1 %v2760_v33 }
  0x1c   :  { %2747 = vmatpush3.bf16.msra.mxu1 %v2760_v33  ;;  %2585 = vmatpush3.bf16.msra.mxu0 %v2760_v33 }
  0x1d   :  { %2740 = vmatprep.subr.bf16.mxu1 %v2761_v38  ;;  %2586 = vmatprep.subr.bf16.mxu0 %v2761_v38 }
  0x1e   :  { %2523 = vmatmul.mubr.msk.bf16.gmra.mrb[12].mxu0 %vm136_vm0, %v96_v31 }
  0x1f   :  { %2526 = vmatprep.mubr.msk.bf16.mxu0 %vm136_vm0, %v97_v32 }
  0x20   :  { %2748 = vmatpush3.bf16.msra.mxu1 %v2761_v38  ;;  %2587 = vmatpush3.bf16.msra.mxu0 %v2761_v38 }
  0x21   :  { %2588 = vmatprep.subr.bf16.mxu0 %v2762_v40  ;;  %2741 = vmatprep.subr.bf16.mxu1 %v2762_v40 }
  0x26   :  { %2527 = vmatmul.mubr.msk.bf16.gmra.mrb[16].mxu0 %vm136_vm0, %v98_v39 }
  0x27   :  { %2530 = vmatprep.mubr.msk.bf16.mxu0 %vm136_vm0, %v99_v41 }
  0x28   :  { %11 = vsyncpa [#allocation3], 0  ;;  %v100_v46 = vpack.c.bf16 %v48_v43, %v47_v42  ;;  %2749 = vmatpush3.bf16.msra.mxu1 %v2762_v40  ;;  %v101_v47 = vpack.c.bf16 %v50_v45, %v49_v44  ;;  %2589 = vmatpush3.bf16.msra.mxu0 %v2762_v40  ;;  %v51_v48 = vld [vmem:[%s3767_s0 + $0xd0] sm:$0xff]  ;;  %v52_v49 = vld [vmem:[%s3767_s0 + $0xd8] sm:$0xff] }
  0x29   :  { %v53_v50 = vld [vmem:[%s3767_s0 + $0xe0] sm:$0xff]  ;;  %v54_v51 = vld [vmem:[%s3767_s0 + $0xe8] sm:$0xff]  ;;  %v102_v52 = vpack.c.bf16 %v52_v49, %v51_v48  ;;  %v55_v54 = vld [vmem:[%s3767_s0 + $0xf0] sm:$0xff] }
  0x2a   :  { %v103_v53 = vpack.c.bf16 %v54_v51, %v53_v50  ;;  %v56_v55 = vld [vmem:[%s3767_s0 + $0xf8] sm:$0xff]  ;;  %v57_v56 = vld [vmem:[%s3767_s0 + $0x100] sm:$0xff]  ;;  %v58_v57 = vld [vmem:[%s3767_s0 + $0x108] sm:$0xff] }
  0x2b   :  { %v104_v58 = vpack.c.bf16 %v56_v55, %v55_v54  ;;  %v105_v59 = vpack.c.bf16 %v58_v57, %v57_v56  ;;  %v59_v60 = vld [vmem:[%s3767_s0 + $0x110] sm:$0xff]  ;;  %v60_v61 = vld [vmem:[%s3767_s0 + $0x118] sm:$0xff]  ;;  %v61_v62 = vld [vmem:[%s3767_s0 + $0x120] sm:$0xff] }
  0x2c   :  { %v62_v63 = vld [vmem:[%s3767_s0 + $0x128] sm:$0xff]  ;;  %v106_v0 = vpack.c.bf16 %v60_v61, %v59_v60  ;;  %v63_v2 = vld [vmem:[%s3767_s0 + $0x130] sm:$0xff]  ;;  %v64_v3 = vld [vmem:[%s3767_s0 + $0x138] sm:$0xff] }
  0x2d   :  { %v107_v1 = vpack.c.bf16 %v62_v63, %v61_v62  ;;  %v65_v4 = vld [vmem:[%s3767_s0 + $0x140] sm:$0xff]  ;;  %v66_v5 = vld [vmem:[%s3767_s0 + $0x148] sm:$0xff]  ;;  %v108_v6 = vpack.c.bf16 %v64_v3, %v63_v2  ;;  %v67_v8 = vld [vmem:[%s3767_s0 + $0x150] sm:$0xff] }
  0x2e   :  { %2531 = vmatmul.mubr.msk.bf16.gmra.mrb[20].mxu0 %vm136_vm0, %v100_v46  ;;  %v109_v7 = vpack.c.bf16 %v66_v5, %v65_v4  ;;  %v68_v9 = vld [vmem:[%s3767_s0 + $0x158] sm:$0xff]  ;;  %v69_v10 = vld [vmem:[%s3767_s0 + $0x160] sm:$0xff]  ;;  %v70_v11 = vld [vmem:[%s3767_s0 + $0x168] sm:$0xff] }
  0x2f   :  { %2534 = vmatprep.mubr.msk.bf16.mxu0 %vm136_vm0, %v101_v47  ;;  %v110_v12 = vpack.c.bf16 %v68_v9, %v67_v8  ;;  %v111_v13 = vpack.c.bf16 %v70_v11, %v69_v10  ;;  %v71_v14 = vld [vmem:[%s3767_s0 + $0x170] sm:$0xff]  ;;  %v72_v15 = vld [vmem:[%s3767_s0 + $0x178] sm:$0xff]  ;;  %v73_v16 = vld [vmem:[%s3767_s0 + $0x180] sm:$0xff] }
  0x30   :  { %v74_v17 = vld [vmem:[%s3767_s0 + $0x188] sm:$0xff]  ;;  %v112_v18 = vpack.c.bf16 %v72_v15, %v71_v14  ;;  %v75_v20 = vld [vmem:[%s3767_s0 + $0x190] sm:$0xff]  ;;  %v76_v21 = vld [vmem:[%s3767_s0 + $0x198] sm:$0xff] }
  0x31   :  { %v113_v19 = vpack.c.bf16 %v74_v17, %v73_v16  ;;  %v77_v22 = vld [vmem:[%s3767_s0 + $0x1a0] sm:$0xff]  ;;  %v78_v23 = vld [vmem:[%s3767_s0 + $0x1a8] sm:$0xff]  ;;  %v114_v24 = vpack.c.bf16 %v76_v21, %v75_v20  ;;  %v79_v26 = vld [vmem:[%s3767_s0 + $0x1b0] sm:$0xff] }
  0x32   :  { %v115_v25 = vpack.c.bf16 %v78_v23, %v77_v22  ;;  %v80_v27 = vld [vmem:[%s3767_s0 + $0x1b8] sm:$0xff]  ;;  %v81_v28 = vld [vmem:[%s3767_s0 + $0x1c0] sm:$0xff]  ;;  %v82_v29 = vld [vmem:[%s3767_s0 + $0x1c8] sm:$0xff] }
  0x33   :  { %v116_v30 = vpack.c.bf16 %v80_v27, %v79_v26  ;;  %v117_v31 = vpack.c.bf16 %v82_v29, %v81_v28  ;;  %v83_v32 = vld [vmem:[%s3767_s0 + $0x1d0] sm:$0xff]  ;;  %v84_v33 = vld [vmem:[%s3767_s0 + $0x1d8] sm:$0xff]  ;;  %v85_v34 = vld [vmem:[%s3767_s0 + $0x1e0] sm:$0xff] }
  0x34   :  { %v86_v35 = vld [vmem:[%s3767_s0 + $0x1e8] sm:$0xff]  ;;  %v118_v36 = vpack.c.bf16 %v84_v33, %v83_v32  ;;  %v87_v38 = vld [vmem:[%s3767_s0 + $0x1f0] sm:$0xff]  ;;  %v88_v39 = vld [vmem:[%s3767_s0 + $0x1f8] sm:$0xff] }
  0x35   :  { %v119_v37 = vpack.c.bf16 %v86_v35, %v85_v34  ;;  %v120_v40 = vpack.c.bf16 %v88_v39, %v87_v38  ;;  %v2763_v41 = vld [vmem:[%s3770_s3] sm:$0xff]   ;;  %v2764_v60 = vld [vmem:[%s3770_s3 + $0x8] sm:$0xff]   ;;  %v2765_v5 = vld [vmem:[%s3770_s3 + $0x10] sm:$0xff]  }
  0x36   :  { %2535 = vmatmul.mubr.msk.bf16.gmra.mrb[24].mxu0 %vm136_vm0, %v102_v52  ;;  %2654 = vmatprep.subr.bf16.mxu0 %v2763_v41  ;;  %v3243_v42 = vld [vmem:[%s3772_s5] ss:$0 sm:$0xff]  ;;  %v2768_v28 = vld [vmem:[%s3770_s3 + $0x28] sm:$0xff]  }
  0x37   :  { %2538 = vmatprep.mubr.msk.bf16.mxu0 %vm136_vm0, %v103_v53  ;;  %v2767_v21 = vld [vmem:[%s3770_s3 + $0x20] sm:$0xff]  }
  0x3e   :  { %2539 = vmatmul.mubr.msk.bf16.gmra.mrb[28].mxu0 %vm136_vm0, %v104_v58 }
  0x3f   :  { %2542 = vmatprep.mubr.msk.bf16.mxu0 %vm136_vm0, %v105_v59 }
  0x46   :  { %2543 = vmatmul.mubr.msk.bf16.gmra.mrb[32].mxu0 %vm136_vm0, %v106_v0 }
  0x47   :  { %2546 = vmatprep.mubr.msk.bf16.mxu0 %vm136_vm0, %v107_v1 }
  0x4e   :  { %2547 = vmatmul.mubr.msk.bf16.gmra.mrb[36].mxu0 %vm136_vm0, %v108_v6 }
  0x4f   :  { %2550 = vmatprep.mubr.msk.bf16.mxu0 %vm136_vm0, %v109_v7 }
  0x56   :  { %2551 = vmatmul.mubr.msk.bf16.gmra.mrb[40].mxu0 %vm136_vm0, %v110_v12  ;;  %v2766_v12 = vld [vmem:[%s3770_s3 + $0x18] sm:$0xff]  }
  0x57   :  { %2554 = vmatprep.mubr.msk.bf16.mxu0 %vm136_vm0, %v111_v13 }
  0x5e   :  { %2555 = vmatmul.mubr.msk.bf16.gmra.mrb[44].mxu0 %vm136_vm0, %v112_v18 }
  0x5f   :  { %2558 = vmatprep.mubr.msk.bf16.mxu0 %vm136_vm0, %v113_v19 }
  0x66   :  { %2559 = vmatmul.mubr.msk.bf16.gmra.mrb[48].mxu0 %vm136_vm0, %v114_v24 }
  0x67   :  { %2562 = vmatprep.mubr.msk.bf16.mxu0 %vm136_vm0, %v115_v25 }
  0x6e   :  { %2563 = vmatmul.mubr.msk.bf16.gmra.mrb[52].mxu0 %vm136_vm0, %v116_v30 }
  0x6f   :  { %2566 = vmatprep.mubr.msk.bf16.mxu0 %vm136_vm0, %v117_v31 }
  0x76   :  { %2567 = vmatmul.mubr.msk.bf16.gmra.mrb[56].mxu0 %vm136_vm0, %v118_v36 }
  0x77   :  { %2570 = vmatprep.mubr.msk.bf16.mxu0 %vm136_vm0, %v119_v37 }
  0x7e   :  { %2571 = vmatmul.mubr.msk.bf16.gmra.mrb[60].mxu0 %vm136_vm0, %v120_v40 }
  0xd9   :  { %v2512_v43 = vpop.f32.mrb[0].mxu0 }
  0xda   :  { %v276_v44 = vadd.f32 %v2512_v43, %v3243_v42  ;;  %v267_v45 = vpop.f32.mrb[1].mxu0 }
  0xdb   :  { %v268_v46 = vadd.f32 %v3243_v42, %v267_v45  ;;  %v2513_v47 = vpop.f32.mrb[2].mxu0 }
  0xdc   :  { %v279_v48 = vadd.f32 %v2513_v47, %v3243_v42  ;;  %v270_v49 = vpop.f32.mrb[3].mxu0  ;;  %v524_v51 = vmax.f32 %v276_v44, 0.0 }
  0xdd   :  { %v271_v50 = vadd.f32 %v3243_v42, %v270_v49  ;;  %v522_v53 = vmax.f32 %v268_v46, 0.0 }
  0xde   :  { %v525_v52 = vmax.f32 %v279_v48, 0.0 }
  0xdf   :  { %v523_v54 = vmax.f32 %v271_v50, 0.0 }
  0xe0   :  { %v587_v55 = vpack.c.bf16 %v525_v52, %v524_v51 }
  0xe1   :  { %v586_v56 = vpack.c.bf16 %v523_v54, %v522_v53  ;;  %v2516_v57 = vpop.f32.mrb[4].mxu0 }
  0xe2   :  { %v292_v58 = vadd.f32 %v2516_v57, %v3243_v42  ;;  %v283_v59 = vpop.f32.mrb[5].mxu0 }
  0xe3   :  { %v284_v61 = vadd.f32 %v3243_v42, %v283_v59  ;;  %v2517_v62 = vpop.f32.mrb[6].mxu0  ;;  %2590 = vmatprep.mubr.bf16.mxu0 %v586_v56 }
  0xe4   :  { %v528_v63 = vmax.f32 %v292_v58, 0.0  ;;  %v295_v0 = vadd.f32 %v2517_v62, %v3243_v42  ;;  %v286_v1 = vpop.f32.mrb[7].mxu0  ;;  %2591 = vmatmul.mubr.bf16.vlgmr.msra.gmra.mrb[64].mxu0 %v587_v55 }
  0xe5   :  { %v526_v2 = vmax.f32 %v284_v61, 0.0  ;;  %v287_v3 = vadd.f32 %v3243_v42, %v286_v1  ;;  %2655 = vmatpush3.bf16.msra.mxu0 %v2763_v41 }
  0xe6   :  { %v529_v4 = vmax.f32 %v295_v0, 0.0  ;;  %2656 = vmatprep.subr.bf16.mxu0 %v2764_v60 }
  0xe7   :  { %v527_v6 = vmax.f32 %v287_v3, 0.0 }
  0xe8   :  { %v589_v7 = vpack.c.bf16 %v529_v4, %v528_v63 }
  0xe9   :  { %v588_v8 = vpack.c.bf16 %v527_v6, %v526_v2  ;;  %v2520_v9 = vpop.f32.mrb[8].mxu0  ;;  %2657 = vmatpush3.bf16.msra.mxu0 %v2764_v60 }
  0xea   :  { %v308_v10 = vadd.f32 %v2520_v9, %v3243_v42  ;;  %v299_v11 = vpop.f32.mrb[9].mxu0  ;;  %2658 = vmatprep.subr.bf16.mxu0 %v2765_v5 }
  0xeb   :  { %2594 = vmatprep.mubr.bf16.mxu0 %v588_v8  ;;  %v300_v13 = vadd.f32 %v3243_v42, %v299_v11  ;;  %v2521_v14 = vpop.f32.mrb[10].mxu0 }
  0xec   :  { %2595 = vmatmul.mubr.bf16.gmra.mrb[68].mxu0 %v589_v7  ;;  %v532_v15 = vmax.f32 %v308_v10, 0.0  ;;  %v311_v16 = vadd.f32 %v2521_v14, %v3243_v42  ;;  %v302_v17 = vpop.f32.mrb[11].mxu0 }
  0xed   :  { %v530_v18 = vmax.f32 %v300_v13, 0.0  ;;  %v303_v19 = vadd.f32 %v3243_v42, %v302_v17  ;;  %2659 = vmatpush3.bf16.msra.mxu0 %v2765_v5 }
  0xee   :  { %v533_v20 = vmax.f32 %v311_v16, 0.0  ;;  %2660 = vmatprep.subr.bf16.mxu0 %v2766_v12 }
  0xef   :  { %v531_v22 = vmax.f32 %v303_v19, 0.0 }
  0xf0   :  { %v591_v23 = vpack.c.bf16 %v533_v20, %v532_v15 }
  0xf1   :  { %v590_v24 = vpack.c.bf16 %v531_v22, %v530_v18  ;;  %v2524_v25 = vpop.f32.mrb[12].mxu0  ;;  %2661 = vmatpush3.bf16.msra.mxu0 %v2766_v12 }
  0xf2   :  { %v324_v26 = vadd.f32 %v2524_v25, %v3243_v42  ;;  %v315_v27 = vpop.f32.mrb[13].mxu0  ;;  %2662 = vmatprep.subr.bf16.mxu0 %v2767_v21 }
  0xf3   :  { %2598 = vmatprep.mubr.bf16.mxu0 %v590_v24  ;;  %v316_v29 = vadd.f32 %v3243_v42, %v315_v27  ;;  %v2525_v30 = vpop.f32.mrb[14].mxu0 }
  0xf4   :  { %2599 = vmatmul.mubr.bf16.gmra.mrb[72].mxu0 %v591_v23  ;;  %v536_v31 = vmax.f32 %v324_v26, 0.0  ;;  %v327_v32 = vadd.f32 %v2525_v30, %v3243_v42  ;;  %v318_v33 = vpop.f32.mrb[15].mxu0 }
  0xf5   :  { %v534_v34 = vmax.f32 %v316_v29, 0.0  ;;  %v319_v35 = vadd.f32 %v3243_v42, %v318_v33  ;;  %2663 = vmatpush3.bf16.msra.mxu0 %v2767_v21 }
  0xf6   :  { %v537_v36 = vmax.f32 %v327_v32, 0.0  ;;  %2664 = vmatprep.subr.bf16.mxu0 %v2768_v28 }
  0xf7   :  { %v535_v37 = vmax.f32 %v319_v35, 0.0 }
  0xf8   :  { %v593_v38 = vpack.c.bf16 %v537_v36, %v536_v31 }
  0xf9   :  { %v592_v39 = vpack.c.bf16 %v535_v37, %v534_v34  ;;  %v2528_v40 = vpop.f32.mrb[16].mxu0  ;;  %2665 = vmatpush3.bf16.msra.mxu0 %v2768_v28 }
  0xfa   :  { %v340_v41 = vadd.f32 %v2528_v40, %v3243_v42  ;;  %v331_v43 = vpop.f32.mrb[17].mxu0 }
  0xfb   :  { %2602 = vmatprep.mubr.bf16.mxu0 %v592_v39  ;;  %v332_v44 = vadd.f32 %v3243_v42, %v331_v43  ;;  %v2529_v45 = vpop.f32.mrb[18].mxu0 }
  0xfc   :  { %2603 = vmatmul.mubr.bf16.gmra.mrb[76].mxu0 %v593_v38  ;;  %v540_v46 = vmax.f32 %v340_v41, 0.0  ;;  %v343_v47 = vadd.f32 %v2529_v45, %v3243_v42  ;;  %v334_v48 = vpop.f32.mrb[19].mxu0 }
  0xfd   :  { %v538_v49 = vmax.f32 %v332_v44, 0.0  ;;  %v335_v50 = vadd.f32 %v3243_v42, %v334_v48 }
  0xfe   :  { %v541_v51 = vmax.f32 %v343_v47, 0.0 }
  0xff   :  { %v539_v52 = vmax.f32 %v335_v50, 0.0 }
 0x100   :  { %v595_v53 = vpack.c.bf16 %v541_v51, %v540_v46 }
 0x101   :  { %v594_v54 = vpack.c.bf16 %v539_v52, %v538_v49  ;;  %v2532_v55 = vpop.f32.mrb[20].mxu0 }
 0x102   :  { %v356_v56 = vadd.f32 %v2532_v55, %v3243_v42  ;;  %v347_v57 = vpop.f32.mrb[21].mxu0 }
 0x103   :  { %2606 = vmatprep.mubr.bf16.mxu0 %v594_v54  ;;  %v348_v58 = vadd.f32 %v3243_v42, %v347_v57  ;;  %v2533_v59 = vpop.f32.mrb[22].mxu0 }
 0x104   :  { %2607 = vmatmul.mubr.bf16.gmra.mrb[80].mxu0 %v595_v53  ;;  %v544_v60 = vmax.f32 %v356_v56, 0.0  ;;  %v359_v61 = vadd.f32 %v2533_v59, %v3243_v42  ;;  %v350_v62 = vpop.f32.mrb[23].mxu0 }
 0x105   :  { %v542_v63 = vmax.f32 %v348_v58, 0.0  ;;  %v351_v0 = vadd.f32 %v3243_v42, %v350_v62 }
 0x106   :  { %v545_v1 = vmax.f32 %v359_v61, 0.0 }
 0x107   :  { %v543_v2 = vmax.f32 %v351_v0, 0.0 }
 0x108   :  { %v597_v3 = vpack.c.bf16 %v545_v1, %v544_v60 }
 0x109   :  { %v596_v4 = vpack.c.bf16 %v543_v2, %v542_v63  ;;  %v2536_v5 = vpop.f32.mrb[24].mxu0 }
 0x10a   :  { %v372_v6 = vadd.f32 %v2536_v5, %v3243_v42  ;;  %v363_v7 = vpop.f32.mrb[25].mxu0 }
 0x10b   :  { %2610 = vmatprep.mubr.bf16.mxu0 %v596_v4  ;;  %v364_v8 = vadd.f32 %v3243_v42, %v363_v7  ;;  %v2537_v9 = vpop.f32.mrb[26].mxu0 }
 0x10c   :  { %2611 = vmatmul.mubr.bf16.gmra.mrb[84].mxu0 %v597_v3  ;;  %v548_v10 = vmax.f32 %v372_v6, 0.0  ;;  %v375_v11 = vadd.f32 %v2537_v9, %v3243_v42  ;;  %v366_v12 = vpop.f32.mrb[27].mxu0 }
 0x10d   :  { %v546_v13 = vmax.f32 %v364_v8, 0.0  ;;  %v367_v14 = vadd.f32 %v3243_v42, %v366_v12 }
 0x10e   :  { %v549_v15 = vmax.f32 %v375_v11, 0.0 }
 0x10f   :  { %v547_v16 = vmax.f32 %v367_v14, 0.0 }
 0x110   :  { %v599_v17 = vpack.c.bf16 %v549_v15, %v548_v10 }
 0x111   :  { %v598_v18 = vpack.c.bf16 %v547_v16, %v546_v13  ;;  %v2540_v19 = vpop.f32.mrb[28].mxu0 }
 0x112   :  { %v388_v20 = vadd.f32 %v2540_v19, %v3243_v42  ;;  %v379_v21 = vpop.f32.mrb[29].mxu0 }
 0x113   :  { %2614 = vmatprep.mubr.bf16.mxu0 %v598_v18  ;;  %v380_v22 = vadd.f32 %v3243_v42, %v379_v21  ;;  %v2541_v23 = vpop.f32.mrb[30].mxu0 }
 0x114   :  { %2615 = vmatmul.mubr.bf16.gmra.mrb[88].mxu0 %v599_v17  ;;  %v552_v24 = vmax.f32 %v388_v20, 0.0  ;;  %v391_v25 = vadd.f32 %v2541_v23, %v3243_v42  ;;  %v382_v26 = vpop.f32.mrb[31].mxu0 }
 0x115   :  { %v550_v27 = vmax.f32 %v380_v22, 0.0  ;;  %v383_v28 = vadd.f32 %v3243_v42, %v382_v26 }
 0x116   :  { %v553_v29 = vmax.f32 %v391_v25, 0.0 }
 0x117   :  { %v551_v30 = vmax.f32 %v383_v28, 0.0 }
 0x118   :  { %v601_v31 = vpack.c.bf16 %v553_v29, %v552_v24 }
 0x119   :  { %v600_v32 = vpack.c.bf16 %v551_v30, %v550_v27  ;;  %v2544_v33 = vpop.f32.mrb[32].mxu0 }
 0x11a   :  { %v404_v34 = vadd.f32 %v2544_v33, %v3243_v42  ;;  %v395_v35 = vpop.f32.mrb[33].mxu0 }
 0x11b   :  { %2618 = vmatprep.mubr.bf16.mxu0 %v600_v32  ;;  %v396_v36 = vadd.f32 %v3243_v42, %v395_v35  ;;  %v2545_v37 = vpop.f32.mrb[34].mxu0 }
 0x11c   :  { %2619 = vmatmul.mubr.bf16.gmra.mrb[92].mxu0 %v601_v31  ;;  %v556_v38 = vmax.f32 %v404_v34, 0.0  ;;  %v407_v39 = vadd.f32 %v2545_v37, %v3243_v42  ;;  %v398_v40 = vpop.f32.mrb[35].mxu0 }
 0x11d   :  { %v554_v41 = vmax.f32 %v396_v36, 0.0  ;;  %v399_v43 = vadd.f32 %v3243_v42, %v398_v40 }
 0x11e   :  { %v557_v44 = vmax.f32 %v407_v39, 0.0 }
 0x11f   :  { %v555_v45 = vmax.f32 %v399_v43, 0.0 }
 0x120   :  { %v603_v46 = vpack.c.bf16 %v557_v44, %v556_v38 }
 0x121   :  { %v602_v47 = vpack.c.bf16 %v555_v45, %v554_v41  ;;  %v2548_v48 = vpop.f32.mrb[36].mxu0 }
 0x122   :  { %v420_v49 = vadd.f32 %v2548_v48, %v3243_v42  ;;  %v411_v50 = vpop.f32.mrb[37].mxu0 }
 0x123   :  { %2622 = vmatprep.mubr.bf16.mxu0 %v602_v47  ;;  %v412_v51 = vadd.f32 %v3243_v42, %v411_v50  ;;  %v2549_v52 = vpop.f32.mrb[38].mxu0 }
 0x124   :  { %2623 = vmatmul.mubr.bf16.gmra.mrb[96].mxu0 %v603_v46  ;;  %v560_v53 = vmax.f32 %v420_v49, 0.0  ;;  %v423_v54 = vadd.f32 %v2549_v52, %v3243_v42  ;;  %v414_v55 = vpop.f32.mrb[39].mxu0 }
 0x125   :  { %v558_v56 = vmax.f32 %v412_v51, 0.0  ;;  %v415_v57 = vadd.f32 %v3243_v42, %v414_v55 }
 0x126   :  { %v561_v58 = vmax.f32 %v423_v54, 0.0 }
 0x127   :  { %v559_v59 = vmax.f32 %v415_v57, 0.0 }
 0x128   :  { %v605_v60 = vpack.c.bf16 %v561_v58, %v560_v53  ;;  %v2769_v53 = vld [vmem:[%s3770_s3 + $0x30] sm:$0xff]  }
 0x129   :  { %v604_v61 = vpack.c.bf16 %v559_v59, %v558_v56  ;;  %v2552_v62 = vpop.f32.mrb[40].mxu0  ;;  %2666 = vmatprep.subr.bf16.mxu0 %v2769_v53 }
 0x12a   :  { %v436_v63 = vadd.f32 %v2552_v62, %v3243_v42  ;;  %v427_v0 = vpop.f32.mrb[41].mxu0  ;;  %2667 = vmatpush3.bf16.msra.mxu0 %v2769_v53  ;;  %v2780_v53 = vld [vmem:[%s3771_s4 + $0x30] ss:$8 sps:$4 sm:$0xff]  }
 0x12b   :  { %2626 = vmatprep.mubr.bf16.mxu1 %v604_v61  ;;  %v428_v1 = vadd.f32 %v3243_v42, %v427_v0  ;;  %v2553_v2 = vpop.f32.mrb[42].mxu0  ;;  %v2770_v61 = vld [vmem:[%s3770_s3 + $0x38] sm:$0xff]  }
 0x12c   :  { %2627 = vmatmul.mubr.bf16.vlgmr.msra.gmra.mrb[0].mxu1 %v605_v60  ;;  %v564_v3 = vmax.f32 %v436_v63, 0.0  ;;  %v439_v4 = vadd.f32 %v2553_v2, %v3243_v42  ;;  %v430_v5 = vpop.f32.mrb[43].mxu0  ;;  %2668 = vmatprep.subr.bf16.mxu0 %v2770_v61 }
 0x12d   :  { %v562_v6 = vmax.f32 %v428_v1, 0.0  ;;  %v431_v7 = vadd.f32 %v3243_v42, %v430_v5 }
 0x12e   :  { %v565_v8 = vmax.f32 %v439_v4, 0.0  ;;  %2669 = vmatpush3.bf16.msra.mxu0 %v2770_v61 }
 0x12f   :  { %v563_v9 = vmax.f32 %v431_v7, 0.0 }
 0x130   :  { %v607_v10 = vpack.c.bf16 %v565_v8, %v564_v3 }
 0x131   :  { %v606_v11 = vpack.c.bf16 %v563_v9, %v562_v6  ;;  %v2556_v12 = vpop.f32.mrb[44].mxu0 }
 0x132   :  { %v452_v13 = vadd.f32 %v2556_v12, %v3243_v42  ;;  %v443_v14 = vpop.f32.mrb[45].mxu0 }
 0x133   :  { %2630 = vmatprep.mubr.bf16.mxu1 %v606_v11  ;;  %v444_v15 = vadd.f32 %v3243_v42, %v443_v14  ;;  %v2557_v16 = vpop.f32.mrb[46].mxu0 }
 0x134   :  { %2631 = vmatmul.mubr.bf16.gmra.mrb[4].mxu1 %v607_v10  ;;  %v568_v17 = vmax.f32 %v452_v13, 0.0  ;;  %v455_v18 = vadd.f32 %v2557_v16, %v3243_v42  ;;  %v446_v19 = vpop.f32.mrb[47].mxu0 }
 0x135   :  { %v566_v20 = vmax.f32 %v444_v15, 0.0  ;;  %v447_v21 = vadd.f32 %v3243_v42, %v446_v19 }
 0x136   :  { %v569_v22 = vmax.f32 %v455_v18, 0.0 }
 0x137   :  { %v567_v23 = vmax.f32 %v447_v21, 0.0  ;;  %v2771_v21 = vld [vmem:[%s3771_s4] ss:$8 sps:$4 sm:$0xff]  }
 0x138   :  { %v609_v24 = vpack.c.bf16 %v569_v22, %v568_v17  ;;  %v2773_v22 = vld [vmem:[%s3771_s4 + $0x4] ss:$8 sps:$4 sm:$0xff]  }
 0x139   :  { %v608_v25 = vpack.c.bf16 %v567_v23, %v566_v20  ;;  %v2560_v26 = vpop.f32.mrb[48].mxu0  ;;  %v3339_v23 = vld [vmem:[%s3772_s5 + $0x1] ss:$0 sm:$0xff]  ;;  %1830 = vmatprep.subr.bf16.mxu1 %v2773_v22 }
 0x13a   :  { %v468_v27 = vadd.f32 %v2560_v26, %v3243_v42  ;;  %v459_v28 = vpop.f32.mrb[49].mxu0  ;;  %1831 = vmatpush1.bf16.msra.mxu1 %v2771_v21  ;;  %v2791_v21 = vld [vmem:[%s3771_s4 + $0x64] ss:$8 sps:$4 sm:$0xff]  }
 0x13b   :  { %2634 = vmatprep.mubr.bf16.mxu1 %v608_v25  ;;  %v460_v29 = vadd.f32 %v3243_v42, %v459_v28  ;;  %v2561_v30 = vpop.f32.mrb[50].mxu0 }
 0x13c   :  { %2635 = vmatmul.mubr.bf16.gmra.mrb[8].mxu1 %v609_v24  ;;  %v572_v31 = vmax.f32 %v468_v27, 0.0  ;;  %v471_v32 = vadd.f32 %v2561_v30, %v3243_v42  ;;  %v462_v33 = vpop.f32.mrb[51].mxu0 }
 0x13d   :  { %v570_v34 = vmax.f32 %v460_v29, 0.0  ;;  %v463_v35 = vadd.f32 %v3243_v42, %v462_v33  ;;  %v2774_v33 = vld [vmem:[%s3771_s4 + $0x10] ss:$8 sps:$4 sm:$0xff]  }
 0x13e   :  { %v573_v36 = vmax.f32 %v471_v32, 0.0 }
 0x13f   :  { %v571_v37 = vmax.f32 %v463_v35, 0.0 }
 0x140   :  { %v611_v38 = vpack.c.bf16 %v573_v36, %v572_v31 }
 0x141   :  { %v610_v39 = vpack.c.bf16 %v571_v37, %v570_v34  ;;  %v2564_v40 = vpop.f32.mrb[52].mxu0  ;;  %v2776_v34 = vld [vmem:[%s3771_s4 + $0x14] ss:$8 sps:$4 sm:$0xff]  }
 0x142   :  { %v484_v41 = vadd.f32 %v2564_v40, %v3243_v42  ;;  %v475_v43 = vpop.f32.mrb[53].mxu0  ;;  %1832 = vmatprep.subr.bf16.mxu1 %v2776_v34  ;;  %v2789_v34 = vld [vmem:[%s3771_s4 + $0x60] ss:$8 sps:$4 sm:$0xff]  }
 0x143   :  { %v476_v44 = vadd.f32 %v3243_v42, %v475_v43  ;;  %v2565_v45 = vpop.f32.mrb[54].mxu0  ;;  %2638 = vmatprep.mubr.bf16.mxu1 %v610_v39  ;;  %1833 = vmatpush1.bf16.msra.mxu1 %v2774_v33 }
 0x144   :  { %v576_v46 = vmax.f32 %v484_v41, 0.0  ;;  %v487_v47 = vadd.f32 %v2565_v45, %v3243_v42  ;;  %v478_v48 = vpop.f32.mrb[55].mxu0  ;;  %2639 = vmatmul.mubr.bf16.gmra.mrb[12].mxu1 %v611_v38 }
 0x145   :  { %v574_v49 = vmax.f32 %v476_v44, 0.0  ;;  %v479_v50 = vadd.f32 %v3243_v42, %v478_v48 }
 0x146   :  { %v577_v51 = vmax.f32 %v487_v47, 0.0  ;;  %v2779_v47 = vld [vmem:[%s3771_s4 + $0x24] ss:$8 sps:$4 sm:$0xff]  }
 0x147   :  { %v575_v52 = vmax.f32 %v479_v50, 0.0  ;;  %1834 = vmatprep.subr.bf16.mxu1 %v2779_v47 }
 0x148   :  { %v613_v54 = vpack.c.bf16 %v577_v51, %v576_v46  ;;  %v2777_v46 = vld [vmem:[%s3771_s4 + $0x20] ss:$8 sps:$4 sm:$0xff]   ;;  %v2782_v51 = vld [vmem:[%s3771_s4 + $0x34] ss:$8 sps:$4 sm:$0xff]  }
 0x149   :  { %v612_v55 = vpack.c.bf16 %v575_v52, %v574_v49  ;;  %v2568_v56 = vpop.f32.mrb[56].mxu0  ;;  %1835 = vmatpush1.bf16.msra.mxu1 %v2777_v46 }
 0x14a   :  { %v500_v57 = vadd.f32 %v2568_v56, %v3243_v42  ;;  %v491_v58 = vpop.f32.mrb[57].mxu0  ;;  %1836 = vmatprep.subr.bf16.mxu1 %v2782_v51 }
 0x14b   :  { %v492_v59 = vadd.f32 %v3243_v42, %v491_v58  ;;  %v2569_v60 = vpop.f32.mrb[58].mxu0  ;;  %2642 = vmatprep.mubr.bf16.mxu1 %v612_v55  ;;  %v2785_v55 = vld [vmem:[%s3771_s4 + $0x44] ss:$8 sps:$4 sm:$0xff]  }
 0x14c   :  { %v580_v62 = vmax.f32 %v500_v57, 0.0  ;;  %v503_v63 = vadd.f32 %v2569_v60, %v3243_v42  ;;  %v494_v0 = vpop.f32.mrb[59].mxu0  ;;  %2643 = vmatmul.mubr.bf16.gmra.mrb[16].mxu1 %v613_v54 }
 0x14d   :  { %v578_v1 = vmax.f32 %v492_v59, 0.0  ;;  %v495_v2 = vadd.f32 %v3243_v42, %v494_v0  ;;  %1837 = vmatpush1.bf16.msra.mxu1 %v2780_v53 }
 0x14e   :  { %v581_v3 = vmax.f32 %v503_v63, 0.0  ;;  %1838 = vmatprep.subr.bf16.mxu1 %v2785_v55 }
 0x14f   :  { %v579_v4 = vmax.f32 %v495_v2, 0.0 }
 0x150   :  { %v615_v5 = vpack.c.bf16 %v581_v3, %v580_v62  ;;  %v2783_v3 = vld [vmem:[%s3771_s4 + $0x40] ss:$8 sps:$4 sm:$0xff]  }
 0x151   :  { %v614_v6 = vpack.c.bf16 %v579_v4, %v578_v1  ;;  %v2572_v7 = vpop.f32.mrb[60].mxu0  ;;  %1839 = vmatpush1.bf16.msra.mxu1 %v2783_v3 }
 0x152   :  { %v516_v8 = vadd.f32 %v2572_v7, %v3243_v42  ;;  %v507_v9 = vpop.f32.mrb[61].mxu0 }
 0x153   :  { %v508_v10 = vadd.f32 %v3243_v42, %v507_v9  ;;  %v2573_v11 = vpop.f32.mrb[62].mxu0  ;;  %2646 = vmatprep.mubr.bf16.mxu1 %v614_v6 }
 0x154   :  { %v584_v12 = vmax.f32 %v516_v8, 0.0  ;;  %v519_v13 = vadd.f32 %v2573_v11, %v3243_v42  ;;  %v510_v14 = vpop.f32.mrb[63].mxu0  ;;  %2647 = vmatmul.mubr.bf16.gmra.mrb[20].mxu1 %v615_v5  ;;  %v2788_v8 = vld [vmem:[%s3771_s4 + $0x54] ss:$8 sps:$4 sm:$0xff]  }
 0x155   :  { %v582_v15 = vmax.f32 %v508_v10, 0.0  ;;  %v511_v16 = vadd.f32 %v3243_v42, %v510_v14  ;;  %1840 = vmatprep.subr.bf16.mxu1 %v2788_v8 }
 0x156   :  { %v585_v17 = vmax.f32 %v519_v13, 0.0 }
 0x157   :  { %v583_v18 = vmax.f32 %v511_v16, 0.0 }
 0x158   :  { %v617_v19 = vpack.c.bf16 %v585_v17, %v584_v12 }
 0x159   :  { %v616_v20 = vpack.c.bf16 %v583_v18, %v582_v15  ;;  %v2786_v18 = vld [vmem:[%s3771_s4 + $0x50] ss:$8 sps:$4 sm:$0xff]  }
 0x15a   :  { %1841 = vmatpush1.bf16.msra.mxu1 %v2786_v18 }
 0x15b   :  { %2650 = vmatprep.mubr.bf16.mxu1 %v616_v20  ;;  %1842 = vmatprep.subr.bf16.mxu1 %v2791_v21 }
 0x15c   :  { %2651 = vmatmul.mubr.bf16.gmra.mrb[24].mxu1 %v617_v19 }
 0x15e   :  { %1843 = vmatpush1.bf16.msra.mxu1 %v2789_v34 }
 0x1b7   :  { %v2592_v42 = vpop.f32.mrb[64].mxu0 }
 0x1b8   :  { %v732_v24 = vadd.f32 %v2592_v42, %v3339_v23  ;;  %v723_v25 = vpop.f32.mrb[65].mxu0 }
 0x1b9   :  { %v724_v26 = vadd.f32 %v3339_v23, %v723_v25  ;;  %v2593_v27 = vpop.f32.mrb[66].mxu0 }
 0x1ba   :  { %v980_v28 = vmul.f32 0.5, %v732_v24  ;;  %v735_v29 = vadd.f32 %v2593_v27, %v3339_v23  ;;  %v726_v30 = vpop.f32.mrb[67].mxu0 }
 0x1bb   :  { %v978_v31 = vmul.f32 0.5, %v724_v26  ;;  %v727_v32 = vadd.f32 %v3339_v23, %v726_v30 }
 0x1bc   :  { %2795 = vtanh.f32 %v980_v28  ;;  %v981_v35 = vmul.f32 0.5, %v735_v29 }
 0x1bd   :  { %2797 = vtanh.f32 %v978_v31  ;;  %v979_v36 = vmul.f32 0.5, %v727_v32 }
 0x1be   :  { %2799 = vtanh.f32 %v981_v35 }
 0x1bf   :  { %2801 = vtanh.f32 %v979_v36  ;;  %v2596_v37 = vpop.f32.mrb[68].mxu0 }
 0x1c0   :  { %v748_v38 = vadd.f32 %v2596_v37, %v3339_v23  ;;  %v739_v39 = vpop.f32.mrb[69].mxu0 }
 0x1c1   :  { %v740_v40 = vadd.f32 %v3339_v23, %v739_v39  ;;  %v2597_v41 = vpop.f32.mrb[70].mxu0 }
 0x1c2   :  { %v984_v43 = vmul.f32 0.5, %v748_v38  ;;  %v751_v44 = vadd.f32 %v2597_v41, %v3339_v23  ;;  %v742_v45 = vpop.f32.mrb[71].mxu0 }
 0x1c3   :  { %v982_v48 = vmul.f32 0.5, %v740_v40  ;;  %v743_v49 = vadd.f32 %v3339_v23, %v742_v45 }
 0x1c4   :  { %2803 = vtanh.f32 %v984_v43  ;;  %v985_v50 = vmul.f32 0.5, %v751_v44 }
 0x1c5   :  { %2805 = vtanh.f32 %v982_v48  ;;  %v983_v52 = vmul.f32 0.5, %v743_v49 }
 0x1c6   :  { %v2796_v54 = vpop.eup %2795  ;;  %2807 = vtanh.f32 %v985_v50 }
 0x1c7   :  { %v2798_v56 = vpop.eup %2797  ;;  %v1108_v57 = vmul.f32 0.5, %v2796_v54  ;;  %2809 = vtanh.f32 %v983_v52  ;;  %v2600_v58 = vpop.f32.mrb[72].mxu0 }
 0x1c8   :  { %v2800_v59 = vpop.eup %2799  ;;  %v1106_v60 = vmul.f32 0.5, %v2798_v56  ;;  %v764_v61 = vadd.f32 %v2600_v58, %v3339_v23  ;;  %v755_v62 = vpop.f32.mrb[73].mxu0 }
 0x1c9   :  { %v2802_v63 = vpop.eup %2801  ;;  %v1109_v0 = vmul.f32 0.5, %v2800_v59  ;;  %v756_v1 = vadd.f32 %v3339_v23, %v755_v62  ;;  %v2601_v2 = vpop.f32.mrb[74].mxu0  ;;  %v1172_v9 = vadd.f32 0.5, %v1108_v57 }
 0x1ca   :  { %v1107_v4 = vmul.f32 0.5, %v2802_v63  ;;  %v988_v5 = vmul.f32 0.5, %v764_v61  ;;  %v767_v6 = vadd.f32 %v2601_v2, %v3339_v23  ;;  %v758_v7 = vpop.f32.mrb[75].mxu0  ;;  %v1170_v13 = vadd.f32 0.5, %v1106_v60 }
 0x1cb   :  { %v1173_v10 = vadd.f32 0.5, %v1109_v0  ;;  %v986_v11 = vmul.f32 0.5, %v756_v1  ;;  %v759_v12 = vadd.f32 %v3339_v23, %v758_v7 }
 0x1cc   :  { %v1171_v14 = vadd.f32 0.5, %v1107_v4  ;;  %2811 = vtanh.f32 %v988_v5  ;;  %v989_v15 = vmul.f32 0.5, %v767_v6 }
 0x1cd   :  { %v1235_v16 = vpack.c.bf16 %v1173_v10, %v1172_v9  ;;  %2813 = vtanh.f32 %v986_v11  ;;  %v987_v17 = vmul.f32 0.5, %v759_v12 }
 0x1ce   :  { %v2804_v19 = vpop.eup %2803  ;;  %2815 = vtanh.f32 %v989_v15  ;;  %v1234_v20 = vpack.c.bf16 %v1171_v14, %v1170_v13 }
 0x1cf   :  { %v2806_v22 = vpop.eup %2805  ;;  %v1112_v42 = vmul.f32 0.5, %v2804_v19  ;;  %2817 = vtanh.f32 %v987_v17  ;;  %v2604_v24 = vpop.f32.mrb[76].mxu0 }
 0x1d0   :  { %v2808_v25 = vpop.eup %2807  ;;  %v1110_v26 = vmul.f32 0.5, %v2806_v22  ;;  %2670 = vmatprep.mubr.bf16.mxu0 %v1234_v20  ;;  %v780_v27 = vadd.f32 %v2604_v24, %v3339_v23  ;;  %v771_v28 = vpop.f32.mrb[77].mxu0 }
 0x1d1   :  { %v2810_v29 = vpop.eup %2809  ;;  %v1176_v30 = vadd.f32 0.5, %v1112_v42  ;;  %v1113_v31 = vmul.f32 0.5, %v2808_v25  ;;  %2671 = vmatmul.mubr.bf16.vlgmr.msra.gmra.mrb[100].mxu0 %v1235_v16  ;;  %v772_v32 = vadd.f32 %v3339_v23, %v771_v28  ;;  %v2605_v33 = vpop.f32.mrb[78].mxu0 }
 0x1d2   :  { %v1174_v35 = vadd.f32 0.5, %v1110_v26  ;;  %v1111_v36 = vmul.f32 0.5, %v2810_v29  ;;  %v992_v37 = vmul.f32 0.5, %v780_v27  ;;  %v783_v38 = vadd.f32 %v2605_v33, %v3339_v23  ;;  %v774_v39 = vpop.f32.mrb[79].mxu0 }
 0x1d3   :  { %v1177_v40 = vadd.f32 0.5, %v1113_v31  ;;  %v990_v41 = vmul.f32 0.5, %v772_v32  ;;  %v775_v43 = vadd.f32 %v3339_v23, %v774_v39 }
 0x1d4   :  { %v1175_v44 = vadd.f32 0.5, %v1111_v36  ;;  %2819 = vtanh.f32 %v992_v37  ;;  %v993_v45 = vmul.f32 0.5, %v783_v38 }
 0x1d5   :  { %v1237_v46 = vpack.c.bf16 %v1177_v40, %v1176_v30  ;;  %2821 = vtanh.f32 %v990_v41  ;;  %v991_v47 = vmul.f32 0.5, %v775_v43 }
 0x1d6   :  { %v2812_v48 = vpop.eup %2811  ;;  %v1236_v49 = vpack.c.bf16 %v1175_v44, %v1174_v35  ;;  %2823 = vtanh.f32 %v993_v45 }
 0x1d7   :  { %v2814_v50 = vpop.eup %2813  ;;  %v1116_v51 = vmul.f32 0.5, %v2812_v48  ;;  %2825 = vtanh.f32 %v991_v47  ;;  %v2608_v52 = vpop.f32.mrb[80].mxu0 }
 0x1d8   :  { %v2816_v53 = vpop.eup %2815  ;;  %v1114_v54 = vmul.f32 0.5, %v2814_v50  ;;  %2674 = vmatprep.mubr.bf16.mxu0 %v1236_v49  ;;  %v796_v55 = vadd.f32 %v2608_v52, %v3339_v23  ;;  %v787_v56 = vpop.f32.mrb[81].mxu0 }
 0x1d9   :  { %v2818_v57 = vpop.eup %2817  ;;  %v1180_v58 = vadd.f32 0.5, %v1116_v51  ;;  %v1117_v59 = vmul.f32 0.5, %v2816_v53  ;;  %2675 = vmatmul.mubr.bf16.gmra.mrb[104].mxu0 %v1237_v46  ;;  %v788_v60 = vadd.f32 %v3339_v23, %v787_v56  ;;  %v2609_v61 = vpop.f32.mrb[82].mxu0 }
 0x1da   :  { %v1178_v62 = vadd.f32 0.5, %v1114_v54  ;;  %v1115_v63 = vmul.f32 0.5, %v2818_v57  ;;  %v996_v0 = vmul.f32 0.5, %v796_v55  ;;  %v799_v1 = vadd.f32 %v2609_v61, %v3339_v23  ;;  %v790_v2 = vpop.f32.mrb[83].mxu0 }
 0x1db   :  { %v1181_v3 = vadd.f32 0.5, %v1117_v59  ;;  %v994_v4 = vmul.f32 0.5, %v788_v60  ;;  %v791_v5 = vadd.f32 %v3339_v23, %v790_v2 }
 0x1dc   :  { %v1179_v6 = vadd.f32 0.5, %v1115_v63  ;;  %2827 = vtanh.f32 %v996_v0  ;;  %v997_v7 = vmul.f32 0.5, %v799_v1 }
 0x1dd   :  { %v1239_v8 = vpack.c.bf16 %v1181_v3, %v1180_v58  ;;  %2829 = vtanh.f32 %v994_v4  ;;  %v995_v9 = vmul.f32 0.5, %v791_v5 }
 0x1de   :  { %v2820_v10 = vpop.eup %2819  ;;  %v1238_v11 = vpack.c.bf16 %v1179_v6, %v1178_v62  ;;  %2831 = vtanh.f32 %v997_v7 }
 0x1df   :  { %v2822_v12 = vpop.eup %2821  ;;  %v1120_v13 = vmul.f32 0.5, %v2820_v10  ;;  %2833 = vtanh.f32 %v995_v9  ;;  %v2612_v14 = vpop.f32.mrb[84].mxu0 }
 0x1e0   :  { %v2824_v15 = vpop.eup %2823  ;;  %v1118_v16 = vmul.f32 0.5, %v2822_v12  ;;  %2678 = vmatprep.mubr.bf16.mxu0 %v1238_v11  ;;  %v812_v17 = vadd.f32 %v2612_v14, %v3339_v23  ;;  %v803_v18 = vpop.f32.mrb[85].mxu0 }
 0x1e1   :  { %v2826_v19 = vpop.eup %2825  ;;  %v1184_v20 = vadd.f32 0.5, %v1120_v13  ;;  %v1121_v21 = vmul.f32 0.5, %v2824_v15  ;;  %2679 = vmatmul.mubr.bf16.gmra.mrb[108].mxu0 %v1239_v8  ;;  %v804_v22 = vadd.f32 %v3339_v23, %v803_v18  ;;  %v2613_v42 = vpop.f32.mrb[86].mxu0 }
 0x1e2   :  { %v1182_v24 = vadd.f32 0.5, %v1118_v16  ;;  %v1119_v25 = vmul.f32 0.5, %v2826_v19  ;;  %v1000_v26 = vmul.f32 0.5, %v812_v17  ;;  %v815_v27 = vadd.f32 %v2613_v42, %v3339_v23  ;;  %v806_v28 = vpop.f32.mrb[87].mxu0 }
 0x1e3   :  { %v1185_v29 = vadd.f32 0.5, %v1121_v21  ;;  %v998_v30 = vmul.f32 0.5, %v804_v22  ;;  %v807_v31 = vadd.f32 %v3339_v23, %v806_v28 }
 0x1e4   :  { %v1183_v32 = vadd.f32 0.5, %v1119_v25  ;;  %2835 = vtanh.f32 %v1000_v26  ;;  %v1001_v33 = vmul.f32 0.5, %v815_v27 }
 0x1e5   :  { %v1241_v34 = vpack.c.bf16 %v1185_v29, %v1184_v20  ;;  %2837 = vtanh.f32 %v998_v30  ;;  %v999_v35 = vmul.f32 0.5, %v807_v31 }
 0x1e6   :  { %v2828_v36 = vpop.eup %2827  ;;  %v1240_v37 = vpack.c.bf16 %v1183_v32, %v1182_v24  ;;  %2839 = vtanh.f32 %v1001_v33 }
 0x1e7   :  { %v2830_v38 = vpop.eup %2829  ;;  %v1124_v39 = vmul.f32 0.5, %v2828_v36  ;;  %2841 = vtanh.f32 %v999_v35  ;;  %v2616_v40 = vpop.f32.mrb[88].mxu0 }
 0x1e8   :  { %v2832_v41 = vpop.eup %2831  ;;  %v1122_v43 = vmul.f32 0.5, %v2830_v38  ;;  %2682 = vmatprep.mubr.bf16.mxu0 %v1240_v37  ;;  %v828_v44 = vadd.f32 %v2616_v40, %v3339_v23  ;;  %v819_v45 = vpop.f32.mrb[89].mxu0 }
 0x1e9   :  { %v2834_v46 = vpop.eup %2833  ;;  %v1188_v47 = vadd.f32 0.5, %v1124_v39  ;;  %v1125_v48 = vmul.f32 0.5, %v2832_v41  ;;  %2683 = vmatmul.mubr.bf16.gmra.mrb[112].mxu0 %v1241_v34  ;;  %v820_v49 = vadd.f32 %v3339_v23, %v819_v45  ;;  %v2617_v50 = vpop.f32.mrb[90].mxu0 }
 0x1ea   :  { %v1186_v51 = vadd.f32 0.5, %v1122_v43  ;;  %v1123_v52 = vmul.f32 0.5, %v2834_v46  ;;  %v1004_v53 = vmul.f32 0.5, %v828_v44  ;;  %v831_v54 = vadd.f32 %v2617_v50, %v3339_v23  ;;  %v822_v55 = vpop.f32.mrb[91].mxu0 }
 0x1eb   :  { %v1189_v56 = vadd.f32 0.5, %v1125_v48  ;;  %v1002_v57 = vmul.f32 0.5, %v820_v49  ;;  %v823_v58 = vadd.f32 %v3339_v23, %v822_v55 }
 0x1ec   :  { %v1187_v59 = vadd.f32 0.5, %v1123_v52  ;;  %2843 = vtanh.f32 %v1004_v53  ;;  %v1005_v60 = vmul.f32 0.5, %v831_v54 }
 0x1ed   :  { %v1243_v61 = vpack.c.bf16 %v1189_v56, %v1188_v47  ;;  %2845 = vtanh.f32 %v1002_v57  ;;  %v1003_v62 = vmul.f32 0.5, %v823_v58 }
 0x1ee   :  { %v2836_v63 = vpop.eup %2835  ;;  %v1242_v0 = vpack.c.bf16 %v1187_v59, %v1186_v51  ;;  %2847 = vtanh.f32 %v1005_v60 }
 0x1ef   :  { %v2838_v1 = vpop.eup %2837  ;;  %v1128_v2 = vmul.f32 0.5, %v2836_v63  ;;  %2849 = vtanh.f32 %v1003_v62  ;;  %v2620_v3 = vpop.f32.mrb[92].mxu0 }
 0x1f0   :  { %v2840_v4 = vpop.eup %2839  ;;  %v1126_v5 = vmul.f32 0.5, %v2838_v1  ;;  %2686 = vmatprep.mubr.bf16.mxu0 %v1242_v0  ;;  %v844_v6 = vadd.f32 %v2620_v3, %v3339_v23  ;;  %v835_v7 = vpop.f32.mrb[93].mxu0 }
 0x1f1   :  { %v2842_v8 = vpop.eup %2841  ;;  %v1192_v9 = vadd.f32 0.5, %v1128_v2  ;;  %v1129_v10 = vmul.f32 0.5, %v2840_v4  ;;  %2687 = vmatmul.mubr.bf16.gmra.mrb[116].mxu0 %v1243_v61  ;;  %v836_v11 = vadd.f32 %v3339_v23, %v835_v7  ;;  %v2621_v12 = vpop.f32.mrb[94].mxu0 }
 0x1f2   :  { %v1190_v13 = vadd.f32 0.5, %v1126_v5  ;;  %v1127_v14 = vmul.f32 0.5, %v2842_v8  ;;  %v1008_v15 = vmul.f32 0.5, %v844_v6  ;;  %v847_v16 = vadd.f32 %v2621_v12, %v3339_v23  ;;  %v838_v17 = vpop.f32.mrb[95].mxu0 }
 0x1f3   :  { %v1193_v18 = vadd.f32 0.5, %v1129_v10  ;;  %v1006_v19 = vmul.f32 0.5, %v836_v11  ;;  %v839_v20 = vadd.f32 %v3339_v23, %v838_v17 }
 0x1f4   :  { %v1191_v21 = vadd.f32 0.5, %v1127_v14  ;;  %2851 = vtanh.f32 %v1008_v15  ;;  %v1009_v22 = vmul.f32 0.5, %v847_v16 }
 0x1f5   :  { %v1245_v42 = vpack.c.bf16 %v1193_v18, %v1192_v9  ;;  %2853 = vtanh.f32 %v1006_v19  ;;  %v1007_v24 = vmul.f32 0.5, %v839_v20 }
 0x1f6   :  { %v2844_v25 = vpop.eup %2843  ;;  %v1244_v26 = vpack.c.bf16 %v1191_v21, %v1190_v13  ;;  %2855 = vtanh.f32 %v1009_v22 }
 0x1f7   :  { %v2846_v27 = vpop.eup %2845  ;;  %v1132_v28 = vmul.f32 0.5, %v2844_v25  ;;  %2857 = vtanh.f32 %v1007_v24  ;;  %v2624_v29 = vpop.f32.mrb[96].mxu0 }
 0x1f8   :  { %v2848_v30 = vpop.eup %2847  ;;  %v1130_v31 = vmul.f32 0.5, %v2846_v27  ;;  %2690 = vmatprep.mubr.bf16.mxu0 %v1244_v26  ;;  %v860_v32 = vadd.f32 %v2624_v29, %v3339_v23  ;;  %v851_v33 = vpop.f32.mrb[97].mxu0 }
 0x1f9   :  { %v2850_v34 = vpop.eup %2849  ;;  %v1196_v35 = vadd.f32 0.5, %v1132_v28  ;;  %v1133_v36 = vmul.f32 0.5, %v2848_v30  ;;  %2691 = vmatmul.mubr.bf16.gmra.mrb[120].mxu0 %v1245_v42  ;;  %v852_v37 = vadd.f32 %v3339_v23, %v851_v33  ;;  %v2625_v38 = vpop.f32.mrb[98].mxu0 }
 0x1fa   :  { %v1194_v39 = vadd.f32 0.5, %v1130_v31  ;;  %v1131_v40 = vmul.f32 0.5, %v2850_v34  ;;  %v1012_v41 = vmul.f32 0.5, %v860_v32  ;;  %v863_v43 = vadd.f32 %v2625_v38, %v3339_v23  ;;  %v854_v44 = vpop.f32.mrb[99].mxu0 }
 0x1fb   :  { %v1197_v45 = vadd.f32 0.5, %v1133_v36  ;;  %v1010_v46 = vmul.f32 0.5, %v852_v37  ;;  %v855_v47 = vadd.f32 %v3339_v23, %v854_v44 }
 0x1fc   :  { %v1195_v48 = vadd.f32 0.5, %v1131_v40  ;;  %2859 = vtanh.f32 %v1012_v41  ;;  %v1013_v49 = vmul.f32 0.5, %v863_v43 }
 0x1fd   :  { %v1247_v50 = vpack.c.bf16 %v1197_v45, %v1196_v35  ;;  %2861 = vtanh.f32 %v1010_v46  ;;  %v1011_v51 = vmul.f32 0.5, %v855_v47 }
 0x1fe   :  { %v2852_v52 = vpop.eup %2851  ;;  %v1246_v53 = vpack.c.bf16 %v1195_v48, %v1194_v39  ;;  %2863 = vtanh.f32 %v1013_v49 }
 0x1ff   :  { %v2854_v54 = vpop.eup %2853  ;;  %v1136_v55 = vmul.f32 0.5, %v2852_v52  ;;  %2865 = vtanh.f32 %v1011_v51  ;;  %v2628_v56 = vpop.f32.mrb[0].mxu1 }
 0x200   :  { %v2856_v57 = vpop.eup %2855  ;;  %v1134_v58 = vmul.f32 0.5, %v2854_v54  ;;  %2694 = vmatprep.mubr.bf16.mxu0 %v1246_v53  ;;  %v876_v59 = vadd.f32 %v2628_v56, %v3339_v23  ;;  %v867_v60 = vpop.f32.mrb[1].mxu1 }
 0x201   :  { %v2858_v61 = vpop.eup %2857  ;;  %v1200_v62 = vadd.f32 0.5, %v1136_v55  ;;  %v1137_v63 = vmul.f32 0.5, %v2856_v57  ;;  %2695 = vmatmul.mubr.bf16.gmra.mrb[124].mxu0 %v1247_v50  ;;  %v868_v0 = vadd.f32 %v3339_v23, %v867_v60  ;;  %v2629_v1 = vpop.f32.mrb[2].mxu1 }
 0x202   :  { %v1198_v2 = vadd.f32 0.5, %v1134_v58  ;;  %v1135_v3 = vmul.f32 0.5, %v2858_v61  ;;  %v1016_v4 = vmul.f32 0.5, %v876_v59  ;;  %v879_v5 = vadd.f32 %v2629_v1, %v3339_v23  ;;  %v870_v6 = vpop.f32.mrb[3].mxu1 }
 0x203   :  { %v1201_v7 = vadd.f32 0.5, %v1137_v63  ;;  %v1014_v8 = vmul.f32 0.5, %v868_v0  ;;  %v871_v9 = vadd.f32 %v3339_v23, %v870_v6 }
 0x204   :  { %v1199_v10 = vadd.f32 0.5, %v1135_v3  ;;  %2867 = vtanh.f32 %v1016_v4  ;;  %v1017_v11 = vmul.f32 0.5, %v879_v5 }
 0x205   :  { %v1249_v12 = vpack.c.bf16 %v1201_v7, %v1200_v62  ;;  %2869 = vtanh.f32 %v1014_v8  ;;  %v1015_v13 = vmul.f32 0.5, %v871_v9 }
 0x206   :  { %v2860_v14 = vpop.eup %2859  ;;  %v1248_v15 = vpack.c.bf16 %v1199_v10, %v1198_v2  ;;  %2871 = vtanh.f32 %v1017_v11 }
 0x207   :  { %v2862_v16 = vpop.eup %2861  ;;  %v1140_v17 = vmul.f32 0.5, %v2860_v14  ;;  %2873 = vtanh.f32 %v1015_v13  ;;  %v2632_v18 = vpop.f32.mrb[4].mxu1 }
 0x208   :  { %v2864_v19 = vpop.eup %2863  ;;  %v1138_v20 = vmul.f32 0.5, %v2862_v16  ;;  %2698 = vmatprep.mubr.bf16.mxu0 %v1248_v15  ;;  %v892_v21 = vadd.f32 %v2632_v18, %v3339_v23  ;;  %v883_v22 = vpop.f32.mrb[5].mxu1 }
 0x209   :  { %v2866_v42 = vpop.eup %2865  ;;  %v1204_v24 = vadd.f32 0.5, %v1140_v17  ;;  %v1141_v25 = vmul.f32 0.5, %v2864_v19  ;;  %2699 = vmatmul.mubr.bf16.gmra.mrb[128].mxu0 %v1249_v12  ;;  %v884_v26 = vadd.f32 %v3339_v23, %v883_v22  ;;  %v2633_v27 = vpop.f32.mrb[6].mxu1 }
 0x20a   :  { %v1202_v28 = vadd.f32 0.5, %v1138_v20  ;;  %v1139_v29 = vmul.f32 0.5, %v2866_v42  ;;  %v1020_v30 = vmul.f32 0.5, %v892_v21  ;;  %v895_v31 = vadd.f32 %v2633_v27, %v3339_v23  ;;  %v886_v32 = vpop.f32.mrb[7].mxu1 }
 0x20b   :  { %v1205_v33 = vadd.f32 0.5, %v1141_v25  ;;  %v1018_v34 = vmul.f32 0.5, %v884_v26  ;;  %v887_v35 = vadd.f32 %v3339_v23, %v886_v32 }
 0x20c   :  { %v1203_v36 = vadd.f32 0.5, %v1139_v29  ;;  %2875 = vtanh.f32 %v1020_v30  ;;  %v1021_v37 = vmul.f32 0.5, %v895_v31 }
 0x20d   :  { %v1251_v38 = vpack.c.bf16 %v1205_v33, %v1204_v24  ;;  %2877 = vtanh.f32 %v1018_v34  ;;  %v1019_v39 = vmul.f32 0.5, %v887_v35 }
 0x20e   :  { %v2868_v40 = vpop.eup %2867  ;;  %v1250_v41 = vpack.c.bf16 %v1203_v36, %v1202_v28  ;;  %2879 = vtanh.f32 %v1021_v37 }
 0x20f   :  { %v2870_v43 = vpop.eup %2869  ;;  %v1144_v44 = vmul.f32 0.5, %v2868_v40  ;;  %2881 = vtanh.f32 %v1019_v39  ;;  %v2636_v45 = vpop.f32.mrb[8].mxu1 }
 0x210   :  { %v2872_v46 = vpop.eup %2871  ;;  %v1142_v47 = vmul.f32 0.5, %v2870_v43  ;;  %2702 = vmatprep.mubr.bf16.mxu0 %v1250_v41  ;;  %v908_v48 = vadd.f32 %v2636_v45, %v3339_v23  ;;  %v899_v49 = vpop.f32.mrb[9].mxu1 }
 0x211   :  { %v2874_v50 = vpop.eup %2873  ;;  %v1208_v51 = vadd.f32 0.5, %v1144_v44  ;;  %v1145_v52 = vmul.f32 0.5, %v2872_v46  ;;  %2703 = vmatmul.mubr.bf16.gmra.mrb[132].mxu0 %v1251_v38  ;;  %v900_v53 = vadd.f32 %v3339_v23, %v899_v49  ;;  %v2637_v54 = vpop.f32.mrb[10].mxu1 }
 0x212   :  { %v1206_v55 = vadd.f32 0.5, %v1142_v47  ;;  %v1143_v56 = vmul.f32 0.5, %v2874_v50  ;;  %v1024_v57 = vmul.f32 0.5, %v908_v48  ;;  %v911_v58 = vadd.f32 %v2637_v54, %v3339_v23  ;;  %v902_v59 = vpop.f32.mrb[11].mxu1 }
 0x213   :  { %v1209_v60 = vadd.f32 0.5, %v1145_v52  ;;  %v1022_v61 = vmul.f32 0.5, %v900_v53  ;;  %v903_v62 = vadd.f32 %v3339_v23, %v902_v59 }
 0x214   :  { %v1207_v63 = vadd.f32 0.5, %v1143_v56  ;;  %2883 = vtanh.f32 %v1024_v57  ;;  %v1025_v0 = vmul.f32 0.5, %v911_v58 }
 0x215   :  { %v1253_v1 = vpack.c.bf16 %v1209_v60, %v1208_v51  ;;  %2885 = vtanh.f32 %v1022_v61  ;;  %v1023_v2 = vmul.f32 0.5, %v903_v62 }
 0x216   :  { %v2876_v3 = vpop.eup %2875  ;;  %v1252_v4 = vpack.c.bf16 %v1207_v63, %v1206_v55  ;;  %2887 = vtanh.f32 %v1025_v0 }
 0x217   :  { %v2878_v5 = vpop.eup %2877  ;;  %v1148_v6 = vmul.f32 0.5, %v2876_v3  ;;  %2889 = vtanh.f32 %v1023_v2  ;;  %v2640_v7 = vpop.f32.mrb[12].mxu1 }
 0x218   :  { %v2880_v8 = vpop.eup %2879  ;;  %v1146_v9 = vmul.f32 0.5, %v2878_v5  ;;  %2706 = vmatprep.mubr.bf16.mxu0 %v1252_v4  ;;  %v924_v10 = vadd.f32 %v2640_v7, %v3339_v23  ;;  %v915_v11 = vpop.f32.mrb[13].mxu1  ;;  %v2792_v7 = vld [vmem:[%s3771_s4 + $0x70] ss:$8 sps:$4 sm:$0xff]  }
 0x219   :  { %v2882_v12 = vpop.eup %2881  ;;  %v1212_v13 = vadd.f32 0.5, %v1148_v6  ;;  %v1149_v14 = vmul.f32 0.5, %v2880_v8  ;;  %2707 = vmatmul.mubr.bf16.gmra.mrb[136].mxu0 %v1253_v1  ;;  %v916_v15 = vadd.f32 %v3339_v23, %v915_v11  ;;  %v2641_v16 = vpop.f32.mrb[14].mxu1  ;;  %v2794_v1 = vld [vmem:[%s3771_s4 + $0x74] ss:$8 sps:$4 sm:$0xff]  }
 0x21a   :  { %v1210_v17 = vadd.f32 0.5, %v1146_v9  ;;  %v1147_v18 = vmul.f32 0.5, %v2882_v12  ;;  %v1028_v19 = vmul.f32 0.5, %v924_v10  ;;  %v927_v20 = vadd.f32 %v2641_v16, %v3339_v23  ;;  %v918_v21 = vpop.f32.mrb[15].mxu1  ;;  %1844 = vmatprep.subr.bf16.mxu1 %v2794_v1 }
 0x21b   :  { %v1213_v22 = vadd.f32 0.5, %v1149_v14  ;;  %v1026_v42 = vmul.f32 0.5, %v916_v15  ;;  %v919_v24 = vadd.f32 %v3339_v23, %v918_v21  ;;  %1845 = vmatpush1.bf16.msra.mxu1 %v2792_v7 }
 0x21c   :  { %v1211_v25 = vadd.f32 0.5, %v1147_v18  ;;  %2891 = vtanh.f32 %v1028_v19  ;;  %v1029_v26 = vmul.f32 0.5, %v927_v20  ;;  %v2947_v20 = vmov 0  }
 0x21d   :  { %v1255_v27 = vpack.c.bf16 %v1213_v22, %v1212_v13  ;;  %2893 = vtanh.f32 %v1026_v42  ;;  %v1027_v28 = vmul.f32 0.5, %v919_v24  ;;  %1862 = vmatprep.mubr.bf16.mxu1 %v2947_v20 }
 0x21e   :  { %v2884_v29 = vpop.eup %2883  ;;  %v1254_v30 = vpack.c.bf16 %v1211_v25, %v1210_v17  ;;  %2895 = vtanh.f32 %v1029_v26 }
 0x21f   :  { %v2886_v31 = vpop.eup %2885  ;;  %v1152_v32 = vmul.f32 0.5, %v2884_v29  ;;  %2897 = vtanh.f32 %v1027_v28  ;;  %v2644_v33 = vpop.f32.mrb[16].mxu1 }
 0x220   :  { %v2888_v34 = vpop.eup %2887  ;;  %v1150_v35 = vmul.f32 0.5, %v2886_v31  ;;  %2710 = vmatprep.mubr.bf16.mxu0 %v1254_v30  ;;  %v940_v36 = vadd.f32 %v2644_v33, %v3339_v23  ;;  %v931_v37 = vpop.f32.mrb[17].mxu1 }
 0x221   :  { %v2890_v38 = vpop.eup %2889  ;;  %v1216_v39 = vadd.f32 0.5, %v1152_v32  ;;  %v1153_v40 = vmul.f32 0.5, %v2888_v34  ;;  %2711 = vmatmul.mubr.bf16.gmra.mrb[140].mxu0 %v1255_v27  ;;  %v932_v41 = vadd.f32 %v3339_v23, %v931_v37  ;;  %v2645_v43 = vpop.f32.mrb[18].mxu1 }
 0x222   :  { %v1214_v44 = vadd.f32 0.5, %v1150_v35  ;;  %v1151_v45 = vmul.f32 0.5, %v2890_v38  ;;  %v1032_v46 = vmul.f32 0.5, %v940_v36  ;;  %v943_v47 = vadd.f32 %v2645_v43, %v3339_v23  ;;  %v934_v48 = vpop.f32.mrb[19].mxu1 }
 0x223   :  { %v1217_v49 = vadd.f32 0.5, %v1153_v40  ;;  %v1030_v50 = vmul.f32 0.5, %v932_v41  ;;  %v935_v51 = vadd.f32 %v3339_v23, %v934_v48 }
 0x224   :  { %v1215_v52 = vadd.f32 0.5, %v1151_v45  ;;  %2899 = vtanh.f32 %v1032_v46  ;;  %v1033_v53 = vmul.f32 0.5, %v943_v47 }
 0x225   :  { %2901 = vtanh.f32 %v1030_v50  ;;  %v1031_v54 = vmul.f32 0.5, %v935_v51  ;;  %v1257_v55 = vpack.c.bf16 %v1217_v49, %v1216_v39 }
 0x226   :  { %v2892_v56 = vpop.eup %2891  ;;  %2903 = vtanh.f32 %v1033_v53  ;;  %v1256_v57 = vpack.c.bf16 %v1215_v52, %v1214_v44 }
 0x227   :  { %v2894_v58 = vpop.eup %2893  ;;  %v1156_v59 = vmul.f32 0.5, %v2892_v56  ;;  %2905 = vtanh.f32 %v1031_v54  ;;  %v2648_v60 = vpop.f32.mrb[20].mxu1 }
 0x228   :  { %v2896_v61 = vpop.eup %2895  ;;  %v1154_v62 = vmul.f32 0.5, %v2894_v58  ;;  %2714 = vmatprep.mubr.bf16.mxu0 %v1256_v57  ;;  %v956_v63 = vadd.f32 %v2648_v60, %v3339_v23  ;;  %v947_v0 = vpop.f32.mrb[21].mxu1 }
 0x229   :  { %v2898_v2 = vpop.eup %2897  ;;  %v1220_v3 = vadd.f32 0.5, %v1156_v59  ;;  %v1157_v4 = vmul.f32 0.5, %v2896_v61  ;;  %2715 = vmatmul.mubr.bf16.gmra.mrb[144].mxu0 %v1257_v55  ;;  %v948_v5 = vadd.f32 %v3339_v23, %v947_v0  ;;  %v2649_v6 = vpop.f32.mrb[22].mxu1 }
 0x22a   :  { %v1218_v8 = vadd.f32 0.5, %v1154_v62  ;;  %v1155_v9 = vmul.f32 0.5, %v2898_v2  ;;  %v1036_v10 = vmul.f32 0.5, %v956_v63  ;;  %v959_v11 = vadd.f32 %v2649_v6, %v3339_v23  ;;  %v950_v12 = vpop.f32.mrb[23].mxu1 }
 0x22b   :  { %v1221_v13 = vadd.f32 0.5, %v1157_v4  ;;  %v1034_v14 = vmul.f32 0.5, %v948_v5  ;;  %v951_v15 = vadd.f32 %v3339_v23, %v950_v12  ;;  %v3451_v12 = vld [vmem:[%s3772_s5 + $0x2] ss:$0 sm:$0xff] }
 0x22c   :  { %v1219_v16 = vadd.f32 0.5, %v1155_v9  ;;  %2907 = vtanh.f32 %v1036_v10  ;;  %v1037_v17 = vmul.f32 0.5, %v959_v11 }
 0x22d   :  { %2909 = vtanh.f32 %v1034_v14  ;;  %v1035_v18 = vmul.f32 0.5, %v951_v15  ;;  %v1259_v19 = vpack.c.bf16 %v1221_v13, %v1220_v3 }
 0x22e   :  { %v2900_v21 = vpop.eup %2899  ;;  %2911 = vtanh.f32 %v1037_v17  ;;  %v1258_v22 = vpack.c.bf16 %v1219_v16, %v1218_v8 }
 0x22f   :  { %v2902_v42 = vpop.eup %2901  ;;  %v1160_v24 = vmul.f32 0.5, %v2900_v21  ;;  %2913 = vtanh.f32 %v1035_v18  ;;  %v2652_v25 = vpop.f32.mrb[24].mxu1 }
 0x230   :  { %v2904_v26 = vpop.eup %2903  ;;  %v1158_v27 = vmul.f32 0.5, %v2902_v42  ;;  %v972_v28 = vadd.f32 %v2652_v25, %v3339_v23  ;;  %v963_v29 = vpop.f32.mrb[25].mxu1  ;;  %2718 = vmatprep.mubr.bf16.mxu0 %v1258_v22 }
 0x231   :  { %v2906_v30 = vpop.eup %2905  ;;  %v1224_v31 = vadd.f32 0.5, %v1160_v24  ;;  %v1161_v32 = vmul.f32 0.5, %v2904_v26  ;;  %v964_v33 = vadd.f32 %v3339_v23, %v963_v29  ;;  %v2653_v34 = vpop.f32.mrb[26].mxu1  ;;  %2719 = vmatmul.mubr.bf16.gmra.mrb[148].mxu0 %v1259_v19 }
 0x232   :  { %v1222_v35 = vadd.f32 0.5, %v1158_v27  ;;  %v1159_v36 = vmul.f32 0.5, %v2906_v30  ;;  %v1040_v37 = vmul.f32 0.5, %v972_v28  ;;  %v975_v38 = vadd.f32 %v2653_v34, %v3339_v23  ;;  %v966_v39 = vpop.f32.mrb[27].mxu1 }
 0x233   :  { %v1225_v40 = vadd.f32 0.5, %v1161_v32  ;;  %v1038_v41 = vmul.f32 0.5, %v964_v33  ;;  %v967_v43 = vadd.f32 %v3339_v23, %v966_v39 }
 0x234   :  { %v1223_v44 = vadd.f32 0.5, %v1159_v36  ;;  %2915 = vtanh.f32 %v1040_v37  ;;  %v1041_v45 = vmul.f32 0.5, %v975_v38 }
 0x235   :  { %2917 = vtanh.f32 %v1038_v41  ;;  %v1039_v46 = vmul.f32 0.5, %v967_v43  ;;  %v1261_v47 = vpack.c.bf16 %v1225_v40, %v1224_v31 }
 0x236   :  { %v2908_v48 = vpop.eup %2907  ;;  %2919 = vtanh.f32 %v1041_v45  ;;  %v1260_v49 = vpack.c.bf16 %v1223_v44, %v1222_v35 }
 0x237   :  { %v2910_v50 = vpop.eup %2909  ;;  %v1164_v51 = vmul.f32 0.5, %v2908_v48  ;;  %2921 = vtanh.f32 %v1039_v46 }
 0x238   :  { %v2912_v52 = vpop.eup %2911  ;;  %v1162_v53 = vmul.f32 0.5, %v2910_v50  ;;  %2722 = vmatprep.mubr.bf16.mxu0 %v1260_v49 }
 0x239   :  { %v2914_v54 = vpop.eup %2913  ;;  %v1228_v55 = vadd.f32 0.5, %v1164_v51  ;;  %v1165_v56 = vmul.f32 0.5, %v2912_v52  ;;  %2723 = vmatmul.mubr.bf16.gmra.mrb[152].mxu0 %v1261_v47 }
 0x23a   :  { %v1226_v23 = vadd.f32 0.5, %v1162_v53  ;;  %v1163_v57 = vmul.f32 0.5, %v2914_v54 }
 0x23b   :  { %v1229_v58 = vadd.f32 0.5, %v1165_v56 }
 0x23c   :  { %v1227_v59 = vadd.f32 0.5, %v1163_v57 }
 0x23d   :  { %v1263_v60 = vpack.c.bf16 %v1229_v58, %v1228_v55 }
 0x23e   :  { %v2916_v61 = vpop.eup %2915  ;;  %v1262_v62 = vpack.c.bf16 %v1227_v59, %v1226_v23 }
 0x23f   :  { %v2918_v63 = vpop.eup %2917  ;;  %v1168_v0 = vmul.f32 0.5, %v2916_v61 }
 0x240   :  { %v2920_v1 = vpop.eup %2919  ;;  %v1166_v2 = vmul.f32 0.5, %v2918_v63  ;;  %2726 = vmatprep.mubr.bf16.mxu0 %v1262_v62 }
 0x241   :  { %v2922_v3 = vpop.eup %2921  ;;  %v1232_v4 = vadd.f32 0.5, %v1168_v0  ;;  %v1169_v5 = vmul.f32 0.5, %v2920_v1  ;;  %2727 = vmatmul.mubr.bf16.gmra.mrb[156].mxu0 %v1263_v60 }
 0x242   :  { %v1230_v6 = vadd.f32 0.5, %v1166_v2  ;;  %v1167_v7 = vmul.f32 0.5, %v2922_v3 }
 0x243   :  { %v1233_v8 = vadd.f32 0.5, %v1169_v5 }
 0x244   :  { %v1231_v9 = vadd.f32 0.5, %v1167_v7 }
 0x245   :  { %v1265_v10 = vpack.c.bf16 %v1233_v8, %v1232_v4 }
 0x246   :  { %v1264_v11 = vpack.c.bf16 %v1231_v9, %v1230_v6 }
 0x248   :  { %2730 = vmatprep.mubr.bf16.mxu0 %v1264_v11 }
 0x249   :  { %2731 = vmatmul.mubr.bf16.gmra.mrb[160].mxu0 %v1265_v10 }
 0x2a4   :  { %v2672_v13 = vpop.f32.mrb[100].mxu0 }
 0x2a5   :  { %v1380_v14 = vadd.f32 %v2672_v13, %v3451_v12  ;;  %v1371_v15 = vpop.f32.mrb[101].mxu0 }
 0x2a6   :  { %v1372_v16 = vadd.f32 %v3451_v12, %v1371_v15  ;;  %v2673_v17 = vpop.f32.mrb[102].mxu0 }
 0x2a7   :  { %v1383_v18 = vadd.f32 %v2673_v17, %v3451_v12  ;;  %v1374_v19 = vpop.f32.mrb[103].mxu0  ;;  %v1628_v22 = vmax.f32 %v1380_v14, 0.0 }
 0x2a8   :  { %v1375_v21 = vadd.f32 %v3451_v12, %v1374_v19  ;;  %v1626_v24 = vmax.f32 %v1372_v16, 0.0 }
 0x2a9   :  { %v1629_v42 = vmax.f32 %v1383_v18, 0.0 }
 0x2aa   :  { %v1627_v25 = vmax.f32 %v1375_v21, 0.0 }
 0x2ab   :  { %v1691_v26 = vpack.c.bf16 %v1629_v42, %v1628_v22 }
 0x2ac   :  { %v1690_v27 = vpack.c.bf16 %v1627_v25, %v1626_v24  ;;  %v2676_v28 = vpop.f32.mrb[104].mxu0 }
 0x2ad   :  { %v1396_v29 = vadd.f32 %v2676_v28, %v3451_v12  ;;  %v1387_v30 = vpop.f32.mrb[105].mxu0 }
 0x2ae   :  { %v1388_v31 = vadd.f32 %v3451_v12, %v1387_v30  ;;  %v2677_v32 = vpop.f32.mrb[106].mxu0  ;;  %1863 = vmatmul.mubr.bf16.vlgmr.msra.gmra.mrb[28].mxu1 %v1690_v27 }
 0x2af   :  { %v1399_v33 = vadd.f32 %v2677_v32, %v3451_v12  ;;  %v1390_v34 = vpop.f32.mrb[107].mxu0  ;;  %1872 = vmatprep.mubr.bf16.mxu1 %v2947_v20  ;;  %v1632_v36 = vmax.f32 %v1396_v29, 0.0 }
 0x2b0   :  { %v1391_v35 = vadd.f32 %v3451_v12, %v1390_v34  ;;  %v1630_v38 = vmax.f32 %v1388_v31, 0.0 }
 0x2b1   :  { %v1633_v37 = vmax.f32 %v1399_v33, 0.0 }
 0x2b2   :  { %v1631_v39 = vmax.f32 %v1391_v35, 0.0 }
 0x2b3   :  { %v1693_v40 = vpack.c.bf16 %v1633_v37, %v1632_v36 }
 0x2b4   :  { %v1692_v41 = vpack.c.bf16 %v1631_v39, %v1630_v38  ;;  %v2680_v43 = vpop.f32.mrb[108].mxu0 }
 0x2b5   :  { %v1412_v44 = vadd.f32 %v2680_v43, %v3451_v12  ;;  %v1403_v45 = vpop.f32.mrb[109].mxu0 }
 0x2b6   :  { %1873 = vmatmul.mubr.bf16.gmra.mrb[32].mxu1 %v1691_v26  ;;  %v1404_v46 = vadd.f32 %v3451_v12, %v1403_v45  ;;  %v2681_v47 = vpop.f32.mrb[110].mxu0 }
 0x2b7   :  { %v1636_v48 = vmax.f32 %v1412_v44, 0.0  ;;  %v1415_v49 = vadd.f32 %v2681_v47, %v3451_v12  ;;  %v1406_v50 = vpop.f32.mrb[111].mxu0  ;;  %1882 = vmatprep.mubr.bf16.mxu1 %v2947_v20 }
 0x2b8   :  { %v1634_v51 = vmax.f32 %v1404_v46, 0.0  ;;  %v1407_v52 = vadd.f32 %v3451_v12, %v1406_v50 }
 0x2b9   :  { %v1637_v53 = vmax.f32 %v1415_v49, 0.0 }
 0x2ba   :  { %v1635_v54 = vmax.f32 %v1407_v52, 0.0 }
 0x2bb   :  { %v1695_v55 = vpack.c.bf16 %v1637_v53, %v1636_v48 }
 0x2bc   :  { %v1694_v56 = vpack.c.bf16 %v1635_v54, %v1634_v51  ;;  %v2684_v23 = vpop.f32.mrb[112].mxu0 }
 0x2bd   :  { %v1428_v57 = vadd.f32 %v2684_v23, %v3451_v12  ;;  %v1419_v58 = vpop.f32.mrb[113].mxu0 }
 0x2be   :  { %1883 = vmatmul.mubr.bf16.gmra.mrb[36].mxu1 %v1692_v41  ;;  %v1420_v59 = vadd.f32 %v3451_v12, %v1419_v58  ;;  %v2685_v60 = vpop.f32.mrb[114].mxu0 }
 0x2bf   :  { %1892 = vmatprep.mubr.bf16.mxu1 %v2947_v20  ;;  %v1640_v61 = vmax.f32 %v1428_v57, 0.0  ;;  %v1431_v62 = vadd.f32 %v2685_v60, %v3451_v12  ;;  %v1422_v63 = vpop.f32.mrb[115].mxu0 }
 0x2c0   :  { %v1638_v0 = vmax.f32 %v1420_v59, 0.0  ;;  %v1423_v1 = vadd.f32 %v3451_v12, %v1422_v63 }
 0x2c1   :  { %v1641_v2 = vmax.f32 %v1431_v62, 0.0 }
 0x2c2   :  { %v1639_v3 = vmax.f32 %v1423_v1, 0.0 }
 0x2c3   :  { %v3472_v4 = vpack.c.bf16 %v1641_v2, %v1640_v61 }
 0x2c4   :  { %v1696_v5 = vpack.c.bf16 %v1639_v3, %v1638_v0  ;;  %v2688_v6 = vpop.f32.mrb[116].mxu0 }
 0x2c5   :  { %v1444_v7 = vadd.f32 %v2688_v6, %v3451_v12  ;;  %v1435_v8 = vpop.f32.mrb[117].mxu0 }
 0x2c6   :  { %1893 = vmatmul.mubr.bf16.gmra.mrb[40].mxu1 %v1693_v40  ;;  %v1436_v9 = vadd.f32 %v3451_v12, %v1435_v8  ;;  %v2689_v10 = vpop.f32.mrb[118].mxu0 }
 0x2c7   :  { %1902 = vmatprep.mubr.bf16.mxu1 %v2947_v20  ;;  %v1644_v11 = vmax.f32 %v1444_v7, 0.0  ;;  %v1447_v13 = vadd.f32 %v2689_v10, %v3451_v12  ;;  %v1438_v14 = vpop.f32.mrb[119].mxu0 }
 0x2c8   :  { %v1642_v15 = vmax.f32 %v1436_v9, 0.0  ;;  %v1439_v16 = vadd.f32 %v3451_v12, %v1438_v14 }
 0x2c9   :  { %v1645_v17 = vmax.f32 %v1447_v13, 0.0 }
 0x2ca   :  { %v1643_v18 = vmax.f32 %v1439_v16, 0.0 }
 0x2cb   :  { %v3479_v19 = vpack.c.bf16 %v1645_v17, %v1644_v11 }
 0x2cc   :  { %v3481_v21 = vpack.c.bf16 %v1643_v18, %v1642_v15  ;;  %v2692_v22 = vpop.f32.mrb[120].mxu0 }
 0x2cd   :  { %v1460_v42 = vadd.f32 %v2692_v22, %v3451_v12  ;;  %v1451_v24 = vpop.f32.mrb[121].mxu0 }
 0x2ce   :  { %1903 = vmatmul.mubr.bf16.gmra.mrb[44].mxu1 %v1694_v56  ;;  %v1452_v25 = vadd.f32 %v3451_v12, %v1451_v24  ;;  %v2693_v26 = vpop.f32.mrb[122].mxu0 }
 0x2cf   :  { %1912 = vmatprep.mubr.bf16.mxu1 %v2947_v20  ;;  %v1648_v27 = vmax.f32 %v1460_v42, 0.0  ;;  %v1463_v28 = vadd.f32 %v2693_v26, %v3451_v12  ;;  %v1454_v29 = vpop.f32.mrb[123].mxu0 }
 0x2d0   :  { %v1646_v30 = vmax.f32 %v1452_v25, 0.0  ;;  %v1455_v31 = vadd.f32 %v3451_v12, %v1454_v29 }
 0x2d1   :  { %v1649_v32 = vmax.f32 %v1463_v28, 0.0 }
 0x2d2   :  { %v1647_v33 = vmax.f32 %v1455_v31, 0.0 }
 0x2d3   :  { %v3488_v34 = vpack.c.bf16 %v1649_v32, %v1648_v27 }
 0x2d4   :  { %v3490_v35 = vpack.c.bf16 %v1647_v33, %v1646_v30  ;;  %v2696_v36 = vpop.f32.mrb[124].mxu0 }
 0x2d5   :  { %v1476_v37 = vadd.f32 %v2696_v36, %v3451_v12  ;;  %v1467_v38 = vpop.f32.mrb[125].mxu0 }
 0x2d6   :  { %1913 = vmatmul.mubr.bf16.gmra.mrb[48].mxu1 %v1695_v55  ;;  %v1468_v39 = vadd.f32 %v3451_v12, %v1467_v38  ;;  %v2697_v40 = vpop.f32.mrb[126].mxu0 }
 0x2d7   :  { %1922 = vmatprep.mubr.bf16.mxu1 %v2947_v20  ;;  %v1652_v41 = vmax.f32 %v1476_v37, 0.0  ;;  %v1479_v43 = vadd.f32 %v2697_v40, %v3451_v12  ;;  %v1470_v44 = vpop.f32.mrb[127].mxu0 }
 0x2d8   :  { %v1650_v45 = vmax.f32 %v1468_v39, 0.0  ;;  %v1471_v46 = vadd.f32 %v3451_v12, %v1470_v44 }
 0x2d9   :  { %v1653_v47 = vmax.f32 %v1479_v43, 0.0 }
 0x2da   :  { %v1651_v48 = vmax.f32 %v1471_v46, 0.0 }
 0x2db   :  { %v3497_v49 = vpack.c.bf16 %v1653_v47, %v1652_v41 }
 0x2dc   :  { %v3499_v50 = vpack.c.bf16 %v1651_v48, %v1650_v45  ;;  %v2700_v51 = vpop.f32.mrb[128].mxu0 }
 0x2dd   :  { %v1492_v52 = vadd.f32 %v2700_v51, %v3451_v12  ;;  %v1483_v53 = vpop.f32.mrb[129].mxu0 }
 0x2de   :  { %1923 = vmatmul.mubr.bf16.gmra.mrb[52].mxu1 %v1696_v5  ;;  %v1484_v54 = vadd.f32 %v3451_v12, %v1483_v53  ;;  %v2701_v55 = vpop.f32.mrb[130].mxu0 }
 0x2df   :  { %1932 = vmatprep.mubr.bf16.mxu1 %v2947_v20  ;;  %v1656_v56 = vmax.f32 %v1492_v52, 0.0  ;;  %v1495_v23 = vadd.f32 %v2701_v55, %v3451_v12  ;;  %v1486_v57 = vpop.f32.mrb[131].mxu0 }
 0x2e0   :  { %v1654_v58 = vmax.f32 %v1484_v54, 0.0  ;;  %v1487_v59 = vadd.f32 %v3451_v12, %v1486_v57 }
 0x2e1   :  { %v1657_v60 = vmax.f32 %v1495_v23, 0.0 }
 0x2e2   :  { %v1655_v61 = vmax.f32 %v1487_v59, 0.0 }
 0x2e3   :  { %v3506_v62 = vpack.c.bf16 %v1657_v60, %v1656_v56 }
 0x2e4   :  { %v3508_v63 = vpack.c.bf16 %v1655_v61, %v1654_v58  ;;  %v2704_v0 = vpop.f32.mrb[132].mxu0 }
 0x2e5   :  { %v1508_v1 = vadd.f32 %v2704_v0, %v3451_v12  ;;  %v1499_v2 = vpop.f32.mrb[133].mxu0 }
 0x2e6   :  { %1933 = vmatmul.mubr.bf16.gmra.mrb[56].mxu1 %v3472_v4  ;;  %v1500_v3 = vadd.f32 %v3451_v12, %v1499_v2  ;;  %v2705_v5 = vpop.f32.mrb[134].mxu0 }
 0x2e7   :  { %1942 = vmatprep.mubr.bf16.mxu1 %v2947_v20  ;;  %v1660_v6 = vmax.f32 %v1508_v1, 0.0  ;;  %v1511_v7 = vadd.f32 %v2705_v5, %v3451_v12  ;;  %v1502_v8 = vpop.f32.mrb[135].mxu0 }
 0x2e8   :  { %v1658_v9 = vmax.f32 %v1500_v3, 0.0  ;;  %v1503_v10 = vadd.f32 %v3451_v12, %v1502_v8 }
 0x2e9   :  { %v1661_v11 = vmax.f32 %v1511_v7, 0.0 }
 0x2ea   :  { %v1659_v13 = vmax.f32 %v1503_v10, 0.0 }
 0x2eb   :  { %v3516_v14 = vpack.c.bf16 %v1661_v11, %v1660_v6 }
 0x2ec   :  { %v3518_v15 = vpack.c.bf16 %v1659_v13, %v1658_v9  ;;  %v2708_v16 = vpop.f32.mrb[136].mxu0 }
 0x2ed   :  { %v1524_v4 = vadd.f32 %v2708_v16, %v3451_v12  ;;  %v1515_v17 = vpop.f32.mrb[137].mxu0 }
 0x2ee   :  { %1943 = vmatmul.mubr.bf16.gmra.mrb[60].mxu1 %v3481_v21  ;;  %v1516_v18 = vadd.f32 %v3451_v12, %v1515_v17  ;;  %v2709_v22 = vpop.f32.mrb[138].mxu0 }
 0x2ef   :  { %1952 = vmatprep.mubr.bf16.mxu1 %v2947_v20  ;;  %v1664_v42 = vmax.f32 %v1524_v4, 0.0  ;;  %v1527_v24 = vadd.f32 %v2709_v22, %v3451_v12  ;;  %v1518_v25 = vpop.f32.mrb[139].mxu0 }
 0x2f0   :  { %v1662_v26 = vmax.f32 %v1516_v18, 0.0  ;;  %v1519_v27 = vadd.f32 %v3451_v12, %v1518_v25 }
 0x2f1   :  { %v1665_v28 = vmax.f32 %v1527_v24, 0.0 }
 0x2f2   :  { %v1663_v29 = vmax.f32 %v1519_v27, 0.0 }
 0x2f3   :  { %v3526_v30 = vpack.c.bf16 %v1665_v28, %v1664_v42 }
 0x2f4   :  { %v3528_v31 = vpack.c.bf16 %v1663_v29, %v1662_v26  ;;  %v2712_v32 = vpop.f32.mrb[140].mxu0 }
 0x2f5   :  { %v1540_v21 = vadd.f32 %v2712_v32, %v3451_v12  ;;  %v1531_v33 = vpop.f32.mrb[141].mxu0 }
 0x2f6   :  { %1953 = vmatmul.mubr.bf16.gmra.mrb[64].mxu1 %v3479_v19  ;;  %v1532_v36 = vadd.f32 %v3451_v12, %v1531_v33  ;;  %v2713_v37 = vpop.f32.mrb[142].mxu0 }
 0x2f7   :  { %1962 = vmatprep.mubr.bf16.mxu1 %v2947_v20  ;;  %v1668_v38 = vmax.f32 %v1540_v21, 0.0  ;;  %v1543_v39 = vadd.f32 %v2713_v37, %v3451_v12  ;;  %v1534_v40 = vpop.f32.mrb[143].mxu0 }
 0x2f8   :  { %v1666_v41 = vmax.f32 %v1532_v36, 0.0  ;;  %v1535_v43 = vadd.f32 %v3451_v12, %v1534_v40 }
 0x2f9   :  { %v1669_v44 = vmax.f32 %v1543_v39, 0.0 }
 0x2fa   :  { %v1667_v45 = vmax.f32 %v1535_v43, 0.0 }
 0x2fb   :  { %v3536_v46 = vpack.c.bf16 %v1669_v44, %v1668_v38 }
 0x2fc   :  { %v3538_v47 = vpack.c.bf16 %v1667_v45, %v1666_v41  ;;  %v2716_v48 = vpop.f32.mrb[144].mxu0 }
 0x2fd   :  { %v1556_v19 = vadd.f32 %v2716_v48, %v3451_v12  ;;  %v1547_v51 = vpop.f32.mrb[145].mxu0 }
 0x2fe   :  { %1963 = vmatmul.mubr.bf16.gmra.mrb[68].mxu1 %v3490_v35  ;;  %v1548_v52 = vadd.f32 %v3451_v12, %v1547_v51  ;;  %v2717_v53 = vpop.f32.mrb[146].mxu0 }
 0x2ff   :  { %1972 = vmatprep.mubr.bf16.mxu1 %v2947_v20  ;;  %v1672_v54 = vmax.f32 %v1556_v19, 0.0  ;;  %v1559_v55 = vadd.f32 %v2717_v53, %v3451_v12  ;;  %v1550_v56 = vpop.f32.mrb[147].mxu0 }
 0x300   :  { %v1670_v23 = vmax.f32 %v1548_v52, 0.0  ;;  %v1551_v57 = vadd.f32 %v3451_v12, %v1550_v56 }
 0x301   :  { %v1673_v58 = vmax.f32 %v1559_v55, 0.0 }
 0x302   :  { %v1671_v59 = vmax.f32 %v1551_v57, 0.0 }
 0x303   :  { %v3546_v60 = vpack.c.bf16 %v1673_v58, %v1672_v54 }
 0x304   :  { %v3548_v61 = vpack.c.bf16 %v1671_v59, %v1670_v23  ;;  %v2720_v0 = vpop.f32.mrb[148].mxu0 }
 0x305   :  { %v1572_v35 = vadd.f32 %v2720_v0, %v3451_v12  ;;  %v1563_v1 = vpop.f32.mrb[149].mxu0 }
 0x306   :  { %1973 = vmatmul.mubr.bf16.gmra.mrb[72].mxu1 %v3488_v34  ;;  %v1564_v2 = vadd.f32 %v3451_v12, %v1563_v1  ;;  %v2721_v3 = vpop.f32.mrb[150].mxu0 }
 0x307   :  { %1982 = vmatprep.mubr.bf16.mxu1 %v2947_v20  ;;  %v1676_v5 = vmax.f32 %v1572_v35, 0.0  ;;  %v1575_v6 = vadd.f32 %v2721_v3, %v3451_v12  ;;  %v1566_v7 = vpop.f32.mrb[151].mxu0 }
 0x308   :  { %v1674_v8 = vmax.f32 %v1564_v2, 0.0  ;;  %v1567_v9 = vadd.f32 %v3451_v12, %v1566_v7 }
 0x309   :  { %v1677_v10 = vmax.f32 %v1575_v6, 0.0 }
 0x30a   :  { %v1675_v11 = vmax.f32 %v1567_v9, 0.0 }
 0x30b   :  { %v3556_v13 = vpack.c.bf16 %v1677_v10, %v1676_v5 }
 0x30c   :  { %v3558_v16 = vpack.c.bf16 %v1675_v11, %v1674_v8  ;;  %v2724_v4 = vpop.f32.mrb[152].mxu0 }
 0x30d   :  { %v1588_v34 = vadd.f32 %v2724_v4, %v3451_v12  ;;  %v1579_v17 = vpop.f32.mrb[153].mxu0 }
 0x30e   :  { %1983 = vmatmul.mubr.bf16.gmra.mrb[76].mxu1 %v3499_v50  ;;  %v1580_v18 = vadd.f32 %v3451_v12, %v1579_v17  ;;  %v2725_v22 = vpop.f32.mrb[154].mxu0 }
 0x30f   :  { %1992 = vmatprep.mubr.bf16.mxu1 %v2947_v20  ;;  %v1680_v42 = vmax.f32 %v1588_v34, 0.0  ;;  %v1591_v24 = vadd.f32 %v2725_v22, %v3451_v12  ;;  %v1582_v25 = vpop.f32.mrb[155].mxu0 }
 0x310   :  { %v1678_v26 = vmax.f32 %v1580_v18, 0.0  ;;  %v1583_v27 = vadd.f32 %v3451_v12, %v1582_v25 }
 0x311   :  { %v1681_v28 = vmax.f32 %v1591_v24, 0.0 }
 0x312   :  { %v1679_v29 = vmax.f32 %v1583_v27, 0.0 }
 0x313   :  { %v3566_v32 = vpack.c.bf16 %v1681_v28, %v1680_v42 }
 0x314   :  { %v1716_v21 = vpack.c.bf16 %v1679_v29, %v1678_v26  ;;  %v2728_v33 = vpop.f32.mrb[156].mxu0 }
 0x315   :  { %v1604_v50 = vadd.f32 %v2728_v33, %v3451_v12  ;;  %v1595_v36 = vpop.f32.mrb[157].mxu0 }
 0x316   :  { %1993 = vmatmul.mubr.bf16.gmra.mrb[80].mxu1 %v3497_v49  ;;  %v1596_v37 = vadd.f32 %v3451_v12, %v1595_v36  ;;  %v2729_v38 = vpop.f32.mrb[158].mxu0 }
 0x317   :  { %2002 = vmatprep.mubr.bf16.mxu1 %v2947_v20  ;;  %v1684_v39 = vmax.f32 %v1604_v50, 0.0  ;;  %v1607_v40 = vadd.f32 %v2729_v38, %v3451_v12  ;;  %v1598_v41 = vpop.f32.mrb[159].mxu0 }
 0x318   :  { %v1682_v43 = vmax.f32 %v1596_v37, 0.0  ;;  %v1599_v44 = vadd.f32 %v3451_v12, %v1598_v41 }
 0x319   :  { %v1685_v45 = vmax.f32 %v1607_v40, 0.0 }
 0x31a   :  { %v1683_v48 = vmax.f32 %v1599_v44, 0.0 }
 0x31b   :  { %v3574_v19 = vpack.c.bf16 %v1685_v45, %v1684_v39 }
 0x31c   :  { %v3576_v51 = vpack.c.bf16 %v1683_v48, %v1682_v43  ;;  %v2732_v52 = vpop.f32.mrb[160].mxu0 }
 0x31d   :  { %v1620_v49 = vadd.f32 %v2732_v52, %v3451_v12  ;;  %v1611_v53 = vpop.f32.mrb[161].mxu0 }
 0x31e   :  { %2003 = vmatmul.mubr.bf16.gmra.mrb[84].mxu1 %v3508_v63  ;;  %v1612_v54 = vadd.f32 %v3451_v12, %v1611_v53  ;;  %v2733_v55 = vpop.f32.mrb[162].mxu0 }
 0x31f   :  { %2012 = vmatprep.mubr.bf16.mxu1 %v2947_v20  ;;  %v1688_v56 = vmax.f32 %v1620_v49, 0.0  ;;  %v1623_v23 = vadd.f32 %v2733_v55, %v3451_v12  ;;  %v1614_v57 = vpop.f32.mrb[163].mxu0 }
 0x320   :  { %v1686_v58 = vmax.f32 %v1612_v54, 0.0  ;;  %v1615_v59 = vadd.f32 %v3451_v12, %v1614_v57  ;;  %v1740_v12 = vlaneseq }
 0x321   :  { %v1689_v0 = vmax.f32 %v1623_v23, 0.0 }
 0x322   :  { %v1687_v35 = vmax.f32 %v1615_v59, 0.0 }
 0x323   :  { %v3584_v1 = vpack.c.bf16 %v1689_v0, %v1688_v56 }
 0x324   :  { %v3586_v2 = vpack.c.bf16 %v1687_v35, %v1686_v58 }
 0x326   :  { %2013 = vmatmul.mubr.bf16.gmra.mrb[88].mxu1 %v3506_v62  ;;  %v1741_v62 = vshrl.u32 %v1740_v12, 7 }
 0x327   :  { %2022 = vmatprep.mubr.bf16.mxu1 %v2947_v20 }
 0x328   :  { %v1742_v63 = vsub.s32 0, %v1741_v62 }
 0x32e   :  { %2023 = vmatmul.mubr.bf16.gmra.mrb[92].mxu1 %v3518_v15  ;;  %v1746_v15 = vsub.s32 1, %v1741_v62 }
 0x32f   :  { %2032 = vmatprep.mubr.bf16.mxu1 %v2947_v20 }
 0x336   :  { %2033 = vmatmul.mubr.bf16.gmra.mrb[96].mxu1 %v3516_v14  ;;  %v1738_v14 = vld [vmem:[%s3772_s5 + $0x3] sm:$0x3]  ;;  %s2948_s5 = smov [#allocation2]  }
 0x337   :  { %2042 = vmatprep.mubr.bf16.mxu1 %v2947_v20  ;;  %s2316_s13 = sshll.u32 %s2948_s5, 4  ;;  %s2317_s13 = int_to_ptr.vmem [resolvable:$true] %s2316_s13 }
 0x338   :  { %s2923_s2 = scalar_lea.vmem %s2317_s13, 16384  ;;  %p2928_p1 = scmp.lt.s32.totalorder %s2317_s13, %s2317_s13 }
 0x339   :  { %p2924_p0 = scmp.ne.s32.totalorder %s2317_s13, %s2923_s2  ;;  %p2929_p2 = scmp.lt.s32.totalorder %s2923_s2, %s2923_s2 }
 0x33b   :  { %p2930_p3 = por %p2929_p2, %p2928_p1 }
 0x33d   :  { %p2931_p4 = pnand %p2930_p3, %p2924_p0 }
 0x33e   :  { %2043 = vmatmul.mubr.bf16.gmra.mrb[100].mxu1 %v3528_v31  ;;  %v3615_v31 = vrot.slane %v1738_v14, %v1746_v15 }
 0x33f   :  { %2052 = vmatprep.mubr.bf16.mxu1 %v2947_v20 }
 0x346   :  { %2053 = vmatmul.mubr.bf16.gmra.mrb[104].mxu1 %v3526_v30  ;;  %v3613_v30 = vrot.slane %v1738_v14, %v1742_v63 }
 0x347   :  { %2062 = vmatprep.mubr.bf16.mxu1 %v2947_v20 }
 0x34e   :  { %2063 = vmatmul.mubr.bf16.gmra.mrb[108].mxu1 %v3538_v47 }
 0x34f   :  { %2072 = vmatprep.mubr.bf16.mxu1 %v2947_v20 }
 0x356   :  { %2073 = vmatmul.mubr.bf16.gmra.mrb[112].mxu1 %v3536_v46 }
 0x357   :  { %2082 = vmatprep.mubr.bf16.mxu1 %v2947_v20 }
 0x35e   :  { %2083 = vmatmul.mubr.bf16.gmra.mrb[116].mxu1 %v3548_v61 }
 0x35f   :  { %2092 = vmatprep.mubr.bf16.mxu1 %v2947_v20 }
 0x366   :  { %2093 = vmatmul.mubr.bf16.gmra.mrb[120].mxu1 %v3546_v60 }
 0x367   :  { %2102 = vmatprep.mubr.bf16.mxu1 %v2947_v20 }
 0x36e   :  { %2103 = vmatmul.mubr.bf16.gmra.mrb[124].mxu1 %v3558_v16 }
 0x36f   :  { %2112 = vmatprep.mubr.bf16.mxu1 %v2947_v20 }
 0x376   :  { %2113 = vmatmul.mubr.bf16.gmra.mrb[128].mxu1 %v3556_v13 }
 0x377   :  { %2122 = vmatprep.mubr.bf16.mxu1 %v2947_v20 }
 0x37e   :  { %2123 = vmatmul.mubr.bf16.gmra.mrb[132].mxu1 %v1716_v21 }
 0x37f   :  { %2132 = vmatprep.mubr.bf16.mxu1 %v2947_v20 }
 0x381   :  { %v1864_v46 = vpop.f32.mrb[28].mxu1 }
 0x382   :  { %v1865_v47 = vadd.f32 %v1864_v46, %v3613_v30  ;;  %v1866_v60 = vpop.f32.mrb[29].mxu1 }
 0x383   :  { %v1867_v61 = vadd.f32 %v1866_v60, %v3615_v31  ;;  %v1868_v3 = vpop.f32.mrb[30].mxu1 }
 0x384   :  { %2183 = vst [vmem:[#allocation2] sm:$0xff] %v1865_v47  ;;  %v1869_v5 = vadd.f32 %v1868_v3, %v3613_v30  ;;  %v1870_v6 = vpop.f32.mrb[31].mxu1 }
 0x385   :  { %2184 = vst [vmem:[#allocation2 + $0x8] sm:$0xff] %v1867_v61  ;;  %v1871_v7 = vadd.f32 %v1870_v6, %v3615_v31 }
 0x386   :  { %2185 = vst [vmem:[#allocation2 + $0x10] sm:$0xff] %v1869_v5  ;;  %2133 = vmatmul.mubr.bf16.gmra.mrb[136].mxu1 %v3566_v32 }
 0x387   :  { %2186 = vst [vmem:[#allocation2 + $0x18] sm:$0xff] %v1871_v7  ;;  %2142 = vmatprep.mubr.bf16.mxu1 %v2947_v20 }
 0x389   :  { %v1874_v8 = vpop.f32.mrb[32].mxu1 }
 0x38a   :  { %v1875_v9 = vadd.f32 %v1874_v8, %v3613_v30  ;;  %v1876_v10 = vpop.f32.mrb[33].mxu1 }
 0x38b   :  { %v1877_v11 = vadd.f32 %v1876_v10, %v3615_v31  ;;  %v1878_v13 = vpop.f32.mrb[34].mxu1 }
 0x38c   :  { %2187 = vst [vmem:[#allocation2 + $0x20] sm:$0xff] %v1875_v9  ;;  %v1879_v16 = vadd.f32 %v1878_v13, %v3613_v30  ;;  %v1880_v4 = vpop.f32.mrb[35].mxu1 }
 0x38d   :  { %2188 = vst [vmem:[#allocation2 + $0x28] sm:$0xff] %v1877_v11  ;;  %v1881_v34 = vadd.f32 %v1880_v4, %v3615_v31 }
 0x38e   :  { %2189 = vst [vmem:[#allocation2 + $0x30] sm:$0xff] %v1879_v16  ;;  %2143 = vmatmul.mubr.bf16.gmra.mrb[140].mxu1 %v3576_v51 }
 0x38f   :  { %2190 = vst [vmem:[#allocation2 + $0x38] sm:$0xff] %v1881_v34  ;;  %2152 = vmatprep.mubr.bf16.mxu1 %v2947_v20 }
 0x391   :  { %v1884_v17 = vpop.f32.mrb[36].mxu1 }
 0x392   :  { %v1885_v18 = vadd.f32 %v1884_v17, %v3613_v30  ;;  %v1886_v22 = vpop.f32.mrb[37].mxu1 }
 0x393   :  { %v1887_v42 = vadd.f32 %v1886_v22, %v3615_v31  ;;  %v1888_v24 = vpop.f32.mrb[38].mxu1 }
 0x394   :  { %2191 = vst [vmem:[#allocation2 + $0x40] sm:$0xff] %v1885_v18  ;;  %v1889_v25 = vadd.f32 %v1888_v24, %v3613_v30  ;;  %v1890_v26 = vpop.f32.mrb[39].mxu1 }
 0x395   :  { %2192 = vst [vmem:[#allocation2 + $0x48] sm:$0xff] %v1887_v42  ;;  %v1891_v27 = vadd.f32 %v1890_v26, %v3615_v31 }
 0x396   :  { %2193 = vst [vmem:[#allocation2 + $0x50] sm:$0xff] %v1889_v25  ;;  %2153 = vmatmul.mubr.bf16.gmra.mrb[144].mxu1 %v3574_v19 }
 0x397   :  { %2194 = vst [vmem:[#allocation2 + $0x58] sm:$0xff] %v1891_v27  ;;  %2162 = vmatprep.mubr.bf16.mxu1 %v2947_v20 }
 0x399   :  { %v1894_v28 = vpop.f32.mrb[40].mxu1 }
 0x39a   :  { %v1895_v29 = vadd.f32 %v1894_v28, %v3613_v30  ;;  %v1896_v32 = vpop.f32.mrb[41].mxu1 }
 0x39b   :  { %v1897_v21 = vadd.f32 %v1896_v32, %v3615_v31  ;;  %v1898_v33 = vpop.f32.mrb[42].mxu1 }
 0x39c   :  { %2195 = vst [vmem:[#allocation2 + $0x60] sm:$0xff] %v1895_v29  ;;  %v1899_v50 = vadd.f32 %v1898_v33, %v3613_v30  ;;  %v1900_v36 = vpop.f32.mrb[43].mxu1 }
 0x39d   :  { %2196 = vst [vmem:[#allocation2 + $0x68] sm:$0xff] %v1897_v21  ;;  %v1901_v37 = vadd.f32 %v1900_v36, %v3615_v31 }
 0x39e   :  { %2197 = vst [vmem:[#allocation2 + $0x70] sm:$0xff] %v1899_v50  ;;  %2163 = vmatmul.mubr.bf16.gmra.mrb[148].mxu1 %v3586_v2 }
 0x39f   :  { %2198 = vst [vmem:[#allocation2 + $0x78] sm:$0xff] %v1901_v37  ;;  %2172 = vmatprep.mubr.bf16.mxu1 %v2947_v20 }
 0x3a1   :  { %v1904_v38 = vpop.f32.mrb[44].mxu1 }
 0x3a2   :  { %v1905_v39 = vadd.f32 %v1904_v38, %v3613_v30  ;;  %v1906_v40 = vpop.f32.mrb[45].mxu1 }
 0x3a3   :  { %v1907_v41 = vadd.f32 %v1906_v40, %v3615_v31  ;;  %v1908_v43 = vpop.f32.mrb[46].mxu1 }
 0x3a4   :  { %2199 = vst [vmem:[#allocation2 + $0x80] sm:$0xff] %v1905_v39  ;;  %v1909_v44 = vadd.f32 %v1908_v43, %v3613_v30  ;;  %v1910_v45 = vpop.f32.mrb[47].mxu1 }
 0x3a5   :  { %2200 = vst [vmem:[#allocation2 + $0x88] sm:$0xff] %v1907_v41  ;;  %v1911_v48 = vadd.f32 %v1910_v45, %v3615_v31 }
 0x3a6   :  { %2201 = vst [vmem:[#allocation2 + $0x90] sm:$0xff] %v1909_v44  ;;  %2173 = vmatmul.mubr.bf16.gmra.mrb[152].mxu1 %v3584_v1 }
 0x3a7   :  { %2202 = vst [vmem:[#allocation2 + $0x98] sm:$0xff] %v1911_v48 }
 0x3a9   :  { %v1914_v19 = vpop.f32.mrb[48].mxu1 }
 0x3aa   :  { %v1915_v20 = vadd.f32 %v1914_v19, %v3613_v30  ;;  %v1916_v51 = vpop.f32.mrb[49].mxu1 }
 0x3ab   :  { %v1917_v52 = vadd.f32 %v1916_v51, %v3615_v31  ;;  %v1918_v49 = vpop.f32.mrb[50].mxu1 }
 0x3ac   :  { %2203 = vst [vmem:[#allocation2 + $0xa0] sm:$0xff] %v1915_v20  ;;  %v1919_v53 = vadd.f32 %v1918_v49, %v3613_v30  ;;  %v1920_v54 = vpop.f32.mrb[51].mxu1 }
 0x3ad   :  { %2204 = vst [vmem:[#allocation2 + $0xa8] sm:$0xff] %v1917_v52  ;;  %v1921_v55 = vadd.f32 %v1920_v54, %v3615_v31 }
 0x3ae   :  { %2205 = vst [vmem:[#allocation2 + $0xb0] sm:$0xff] %v1919_v53 }
 0x3af   :  { %2206 = vst [vmem:[#allocation2 + $0xb8] sm:$0xff] %v1921_v55 }
 0x3b1   :  { %v1924_v56 = vpop.f32.mrb[52].mxu1 }
 0x3b2   :  { %v1925_v23 = vadd.f32 %v1924_v56, %v3613_v30  ;;  %v1926_v57 = vpop.f32.mrb[53].mxu1 }
 0x3b3   :  { %v1927_v58 = vadd.f32 %v1926_v57, %v3615_v31  ;;  %v1928_v59 = vpop.f32.mrb[54].mxu1 }
 0x3b4   :  { %2207 = vst [vmem:[#allocation2 + $0xc0] sm:$0xff] %v1925_v23  ;;  %v1929_v0 = vadd.f32 %v1928_v59, %v3613_v30  ;;  %v1930_v35 = vpop.f32.mrb[55].mxu1 }
 0x3b5   :  { %2208 = vst [vmem:[#allocation2 + $0xc8] sm:$0xff] %v1927_v58  ;;  %v1931_v1 = vadd.f32 %v1930_v35, %v3615_v31 }
 0x3b6   :  { %2209 = vst [vmem:[#allocation2 + $0xd0] sm:$0xff] %v1929_v0 }
 0x3b7   :  { %2210 = vst [vmem:[#allocation2 + $0xd8] sm:$0xff] %v1931_v1 }
 0x3b9   :  { %v1934_v2 = vpop.f32.mrb[56].mxu1 }
 0x3ba   :  { %v1935_v12 = vadd.f32 %v1934_v2, %v3613_v30  ;;  %v1936_v62 = vpop.f32.mrb[57].mxu1 }
 0x3bb   :  { %v1937_v63 = vadd.f32 %v1936_v62, %v3615_v31  ;;  %v1938_v14 = vpop.f32.mrb[58].mxu1 }
 0x3bc   :  { %2211 = vst [vmem:[#allocation2 + $0xe0] sm:$0xff] %v1935_v12  ;;  %v1939_v15 = vadd.f32 %v1938_v14, %v3613_v30  ;;  %v1940_v46 = vpop.f32.mrb[59].mxu1 }
 0x3bd   :  { %2212 = vst [vmem:[#allocation2 + $0xe8] sm:$0xff] %v1937_v63  ;;  %v1941_v47 = vadd.f32 %v1940_v46, %v3615_v31 }
 0x3be   :  { %2213 = vst [vmem:[#allocation2 + $0xf0] sm:$0xff] %v1939_v15 }
 0x3bf   :  { %2214 = vst [vmem:[#allocation2 + $0xf8] sm:$0xff] %v1941_v47 }
 0x3c1   :  { %v1944_v60 = vpop.f32.mrb[60].mxu1 }
 0x3c2   :  { %v1945_v61 = vadd.f32 %v1944_v60, %v3613_v30  ;;  %v1946_v3 = vpop.f32.mrb[61].mxu1 }
 0x3c3   :  { %v1947_v5 = vadd.f32 %v1946_v3, %v3615_v31  ;;  %v1948_v6 = vpop.f32.mrb[62].mxu1 }
 0x3c4   :  { %2215 = vst [vmem:[#allocation2 + $0x100] sm:$0xff] %v1945_v61  ;;  %v1949_v7 = vadd.f32 %v1948_v6, %v3613_v30  ;;  %v1950_v8 = vpop.f32.mrb[63].mxu1 }
 0x3c5   :  { %2216 = vst [vmem:[#allocation2 + $0x108] sm:$0xff] %v1947_v5  ;;  %v1951_v9 = vadd.f32 %v1950_v8, %v3615_v31 }
 0x3c6   :  { %2217 = vst [vmem:[#allocation2 + $0x110] sm:$0xff] %v1949_v7 }
 0x3c7   :  { %2218 = vst [vmem:[#allocation2 + $0x118] sm:$0xff] %v1951_v9 }
 0x3c9   :  { %v1954_v10 = vpop.f32.mrb[64].mxu1 }
 0x3ca   :  { %v1955_v11 = vadd.f32 %v1954_v10, %v3613_v30  ;;  %v1956_v13 = vpop.f32.mrb[65].mxu1 }
 0x3cb   :  { %v1957_v16 = vadd.f32 %v1956_v13, %v3615_v31  ;;  %v1958_v4 = vpop.f32.mrb[66].mxu1 }
 0x3cc   :  { %2219 = vst [vmem:[#allocation2 + $0x120] sm:$0xff] %v1955_v11  ;;  %v1959_v34 = vadd.f32 %v1958_v4, %v3613_v30  ;;  %v1960_v17 = vpop.f32.mrb[67].mxu1 }
 0x3cd   :  { %2220 = vst [vmem:[#allocation2 + $0x128] sm:$0xff] %v1957_v16  ;;  %v1961_v18 = vadd.f32 %v1960_v17, %v3615_v31 }
 0x3ce   :  { %2221 = vst [vmem:[#allocation2 + $0x130] sm:$0xff] %v1959_v34 }
 0x3cf   :  { %2222 = vst [vmem:[#allocation2 + $0x138] sm:$0xff] %v1961_v18 }
 0x3d1   :  { %v1964_v22 = vpop.f32.mrb[68].mxu1 }
 0x3d2   :  { %v1965_v42 = vadd.f32 %v1964_v22, %v3613_v30  ;;  %v1966_v24 = vpop.f32.mrb[69].mxu1 }
 0x3d3   :  { %v1967_v25 = vadd.f32 %v1966_v24, %v3615_v31  ;;  %v1968_v26 = vpop.f32.mrb[70].mxu1 }
 0x3d4   :  { %2223 = vst [vmem:[#allocation2 + $0x140] sm:$0xff] %v1965_v42  ;;  %v1969_v27 = vadd.f32 %v1968_v26, %v3613_v30  ;;  %v1970_v28 = vpop.f32.mrb[71].mxu1 }
 0x3d5   :  { %2224 = vst [vmem:[#allocation2 + $0x148] sm:$0xff] %v1967_v25  ;;  %v1971_v29 = vadd.f32 %v1970_v28, %v3615_v31 }
 0x3d6   :  { %2225 = vst [vmem:[#allocation2 + $0x150] sm:$0xff] %v1969_v27 }
 0x3d7   :  { %2226 = vst [vmem:[#allocation2 + $0x158] sm:$0xff] %v1971_v29 }
 0x3d9   :  { %v1974_v32 = vpop.f32.mrb[72].mxu1 }
 0x3da   :  { %v1975_v21 = vadd.f32 %v1974_v32, %v3613_v30  ;;  %v1976_v33 = vpop.f32.mrb[73].mxu1 }
 0x3db   :  { %v1977_v50 = vadd.f32 %v1976_v33, %v3615_v31  ;;  %v1978_v36 = vpop.f32.mrb[74].mxu1 }
 0x3dc   :  { %2227 = vst [vmem:[#allocation2 + $0x160] sm:$0xff] %v1975_v21  ;;  %v1979_v37 = vadd.f32 %v1978_v36, %v3613_v30  ;;  %v1980_v38 = vpop.f32.mrb[75].mxu1 }
 0x3dd   :  { %2228 = vst [vmem:[#allocation2 + $0x168] sm:$0xff] %v1977_v50  ;;  %v1981_v39 = vadd.f32 %v1980_v38, %v3615_v31 }
 0x3de   :  { %2229 = vst [vmem:[#allocation2 + $0x170] sm:$0xff] %v1979_v37 }
 0x3df   :  { %2230 = vst [vmem:[#allocation2 + $0x178] sm:$0xff] %v1981_v39 }
 0x3e1   :  { %v1984_v40 = vpop.f32.mrb[76].mxu1 }
 0x3e2   :  { %v1985_v41 = vadd.f32 %v1984_v40, %v3613_v30  ;;  %v1986_v43 = vpop.f32.mrb[77].mxu1 }
 0x3e3   :  { %v1987_v44 = vadd.f32 %v1986_v43, %v3615_v31  ;;  %v1988_v45 = vpop.f32.mrb[78].mxu1 }
 0x3e4   :  { %2231 = vst [vmem:[#allocation2 + $0x180] sm:$0xff] %v1985_v41  ;;  %v1989_v48 = vadd.f32 %v1988_v45, %v3613_v30  ;;  %v1990_v19 = vpop.f32.mrb[79].mxu1 }
 0x3e5   :  { %2232 = vst [vmem:[#allocation2 + $0x188] sm:$0xff] %v1987_v44  ;;  %v1991_v20 = vadd.f32 %v1990_v19, %v3615_v31 }
 0x3e6   :  { %2233 = vst [vmem:[#allocation2 + $0x190] sm:$0xff] %v1989_v48 }
 0x3e7   :  { %2234 = vst [vmem:[#allocation2 + $0x198] sm:$0xff] %v1991_v20 }
 0x3e9   :  { %v1994_v51 = vpop.f32.mrb[80].mxu1 }
 0x3ea   :  { %v1995_v52 = vadd.f32 %v1994_v51, %v3613_v30  ;;  %v1996_v49 = vpop.f32.mrb[81].mxu1 }
 0x3eb   :  { %v1997_v53 = vadd.f32 %v1996_v49, %v3615_v31  ;;  %v1998_v54 = vpop.f32.mrb[82].mxu1 }
 0x3ec   :  { %2235 = vst [vmem:[#allocation2 + $0x1a0] sm:$0xff] %v1995_v52  ;;  %v1999_v55 = vadd.f32 %v1998_v54, %v3613_v30  ;;  %v2000_v56 = vpop.f32.mrb[83].mxu1 }
 0x3ed   :  { %2236 = vst [vmem:[#allocation2 + $0x1a8] sm:$0xff] %v1997_v53  ;;  %v2001_v23 = vadd.f32 %v2000_v56, %v3615_v31 }
 0x3ee   :  { %2237 = vst [vmem:[#allocation2 + $0x1b0] sm:$0xff] %v1999_v55 }
 0x3ef   :  { %2238 = vst [vmem:[#allocation2 + $0x1b8] sm:$0xff] %v2001_v23 }
 0x3f1   :  { %v2004_v57 = vpop.f32.mrb[84].mxu1 }
 0x3f2   :  { %v2005_v58 = vadd.f32 %v2004_v57, %v3613_v30  ;;  %v2006_v59 = vpop.f32.mrb[85].mxu1 }
 0x3f3   :  { %v2007_v0 = vadd.f32 %v2006_v59, %v3615_v31  ;;  %v2008_v35 = vpop.f32.mrb[86].mxu1 }
 0x3f4   :  { %2239 = vst [vmem:[#allocation2 + $0x1c0] sm:$0xff] %v2005_v58  ;;  %v2009_v1 = vadd.f32 %v2008_v35, %v3613_v30  ;;  %v2010_v2 = vpop.f32.mrb[87].mxu1 }
 0x3f5   :  { %2240 = vst [vmem:[#allocation2 + $0x1c8] sm:$0xff] %v2007_v0  ;;  %v2011_v12 = vadd.f32 %v2010_v2, %v3615_v31 }
 0x3f6   :  { %2241 = vst [vmem:[#allocation2 + $0x1d0] sm:$0xff] %v2009_v1 }
 0x3f7   :  { %2242 = vst [vmem:[#allocation2 + $0x1d8] sm:$0xff] %v2011_v12 }
 0x3f9   :  { %v2014_v62 = vpop.f32.mrb[88].mxu1 }
 0x3fa   :  { %v2015_v63 = vadd.f32 %v2014_v62, %v3613_v30  ;;  %v2016_v14 = vpop.f32.mrb[89].mxu1 }
 0x3fb   :  { %v2017_v15 = vadd.f32 %v2016_v14, %v3615_v31  ;;  %v2018_v46 = vpop.f32.mrb[90].mxu1 }
 0x3fc   :  { %2243 = vst [vmem:[#allocation2 + $0x1e0] sm:$0xff] %v2015_v63  ;;  %v2019_v47 = vadd.f32 %v2018_v46, %v3613_v30  ;;  %v2020_v60 = vpop.f32.mrb[91].mxu1 }
 0x3fd   :  { %2244 = vst [vmem:[#allocation2 + $0x1e8] sm:$0xff] %v2017_v15  ;;  %v2021_v61 = vadd.f32 %v2020_v60, %v3615_v31 }
 0x3fe   :  { %2245 = vst [vmem:[#allocation2 + $0x1f0] sm:$0xff] %v2019_v47 }
 0x3ff   :  { %2246 = vst [vmem:[#allocation2 + $0x1f8] sm:$0xff] %v2021_v61 }
 0x401   :  { %v2024_v3 = vpop.f32.mrb[92].mxu1 }
 0x402   :  { %v2025_v5 = vadd.f32 %v2024_v3, %v3613_v30  ;;  %v2026_v6 = vpop.f32.mrb[93].mxu1 }
 0x403   :  { %v2027_v7 = vadd.f32 %v2026_v6, %v3615_v31  ;;  %v2028_v8 = vpop.f32.mrb[94].mxu1 }
 0x404   :  { %2247 = vst [vmem:[#allocation2 + $0x200] sm:$0xff] %v2025_v5  ;;  %v2029_v9 = vadd.f32 %v2028_v8, %v3613_v30  ;;  %v2030_v10 = vpop.f32.mrb[95].mxu1 }
 0x405   :  { %2248 = vst [vmem:[#allocation2 + $0x208] sm:$0xff] %v2027_v7  ;;  %v2031_v11 = vadd.f32 %v2030_v10, %v3615_v31 }
 0x406   :  { %2249 = vst [vmem:[#allocation2 + $0x210] sm:$0xff] %v2029_v9 }
 0x407   :  { %2250 = vst [vmem:[#allocation2 + $0x218] sm:$0xff] %v2031_v11 }
 0x409   :  { %v2034_v13 = vpop.f32.mrb[96].mxu1 }
 0x40a   :  { %v2035_v16 = vadd.f32 %v2034_v13, %v3613_v30  ;;  %v2036_v4 = vpop.f32.mrb[97].mxu1 }
 0x40b   :  { %v2037_v34 = vadd.f32 %v2036_v4, %v3615_v31  ;;  %v2038_v17 = vpop.f32.mrb[98].mxu1 }
 0x40c   :  { %2251 = vst [vmem:[#allocation2 + $0x220] sm:$0xff] %v2035_v16  ;;  %v2039_v18 = vadd.f32 %v2038_v17, %v3613_v30  ;;  %v2040_v22 = vpop.f32.mrb[99].mxu1 }
 0x40d   :  { %2252 = vst [vmem:[#allocation2 + $0x228] sm:$0xff] %v2037_v34  ;;  %v2041_v42 = vadd.f32 %v2040_v22, %v3615_v31 }
 0x40e   :  { %2253 = vst [vmem:[#allocation2 + $0x230] sm:$0xff] %v2039_v18 }
 0x40f   :  { %2254 = vst [vmem:[#allocation2 + $0x238] sm:$0xff] %v2041_v42 }
 0x411   :  { %v2044_v24 = vpop.f32.mrb[100].mxu1 }
 0x412   :  { %v2045_v25 = vadd.f32 %v2044_v24, %v3613_v30  ;;  %v2046_v26 = vpop.f32.mrb[101].mxu1 }
 0x413   :  { %v2047_v27 = vadd.f32 %v2046_v26, %v3615_v31  ;;  %v2048_v28 = vpop.f32.mrb[102].mxu1 }
 0x414   :  { %2255 = vst [vmem:[#allocation2 + $0x240] sm:$0xff] %v2045_v25  ;;  %v2049_v29 = vadd.f32 %v2048_v28, %v3613_v30  ;;  %v2050_v32 = vpop.f32.mrb[103].mxu1 }
 0x415   :  { %2256 = vst [vmem:[#allocation2 + $0x248] sm:$0xff] %v2047_v27  ;;  %v2051_v21 = vadd.f32 %v2050_v32, %v3615_v31 }
 0x416   :  { %2257 = vst [vmem:[#allocation2 + $0x250] sm:$0xff] %v2049_v29 }
 0x417   :  { %2258 = vst [vmem:[#allocation2 + $0x258] sm:$0xff] %v2051_v21 }
 0x419   :  { %v2054_v33 = vpop.f32.mrb[104].mxu1 }
 0x41a   :  { %v2055_v50 = vadd.f32 %v2054_v33, %v3613_v30  ;;  %v2056_v36 = vpop.f32.mrb[105].mxu1 }
 0x41b   :  { %v2057_v37 = vadd.f32 %v2056_v36, %v3615_v31  ;;  %v2058_v38 = vpop.f32.mrb[106].mxu1 }
 0x41c   :  { %2259 = vst [vmem:[#allocation2 + $0x260] sm:$0xff] %v2055_v50  ;;  %v2059_v39 = vadd.f32 %v2058_v38, %v3613_v30  ;;  %v2060_v40 = vpop.f32.mrb[107].mxu1 }
 0x41d   :  { %2260 = vst [vmem:[#allocation2 + $0x268] sm:$0xff] %v2057_v37  ;;  %v2061_v41 = vadd.f32 %v2060_v40, %v3615_v31 }
 0x41e   :  { %2261 = vst [vmem:[#allocation2 + $0x270] sm:$0xff] %v2059_v39 }
 0x41f   :  { %2262 = vst [vmem:[#allocation2 + $0x278] sm:$0xff] %v2061_v41 }
 0x421   :  { %v2064_v43 = vpop.f32.mrb[108].mxu1 }
 0x422   :  { %v2065_v44 = vadd.f32 %v2064_v43, %v3613_v30  ;;  %v2066_v45 = vpop.f32.mrb[109].mxu1 }
 0x423   :  { %v2067_v48 = vadd.f32 %v2066_v45, %v3615_v31  ;;  %v2068_v19 = vpop.f32.mrb[110].mxu1 }
 0x424   :  { %2263 = vst [vmem:[#allocation2 + $0x280] sm:$0xff] %v2065_v44  ;;  %v2069_v20 = vadd.f32 %v2068_v19, %v3613_v30  ;;  %v2070_v51 = vpop.f32.mrb[111].mxu1 }
 0x425   :  { %2264 = vst [vmem:[#allocation2 + $0x288] sm:$0xff] %v2067_v48  ;;  %v2071_v52 = vadd.f32 %v2070_v51, %v3615_v31 }
 0x426   :  { %2265 = vst [vmem:[#allocation2 + $0x290] sm:$0xff] %v2069_v20 }
 0x427   :  { %2266 = vst [vmem:[#allocation2 + $0x298] sm:$0xff] %v2071_v52 }
 0x429   :  { %v2074_v49 = vpop.f32.mrb[112].mxu1 }
 0x42a   :  { %v2075_v53 = vadd.f32 %v2074_v49, %v3613_v30  ;;  %v2076_v54 = vpop.f32.mrb[113].mxu1 }
 0x42b   :  { %v2077_v55 = vadd.f32 %v2076_v54, %v3615_v31  ;;  %v2078_v56 = vpop.f32.mrb[114].mxu1 }
 0x42c   :  { %2267 = vst [vmem:[#allocation2 + $0x2a0] sm:$0xff] %v2075_v53  ;;  %v2079_v23 = vadd.f32 %v2078_v56, %v3613_v30  ;;  %v2080_v57 = vpop.f32.mrb[115].mxu1 }
 0x42d   :  { %2268 = vst [vmem:[#allocation2 + $0x2a8] sm:$0xff] %v2077_v55  ;;  %v2081_v58 = vadd.f32 %v2080_v57, %v3615_v31 }
 0x42e   :  { %2269 = vst [vmem:[#allocation2 + $0x2b0] sm:$0xff] %v2079_v23 }
 0x42f   :  { %2270 = vst [vmem:[#allocation2 + $0x2b8] sm:$0xff] %v2081_v58 }
 0x431   :  { %v2084_v59 = vpop.f32.mrb[116].mxu1 }
 0x432   :  { %v2085_v0 = vadd.f32 %v2084_v59, %v3613_v30  ;;  %v2086_v35 = vpop.f32.mrb[117].mxu1 }
 0x433   :  { %v2087_v1 = vadd.f32 %v2086_v35, %v3615_v31  ;;  %v2088_v2 = vpop.f32.mrb[118].mxu1 }
 0x434   :  { %2271 = vst [vmem:[#allocation2 + $0x2c0] sm:$0xff] %v2085_v0  ;;  %v2089_v12 = vadd.f32 %v2088_v2, %v3613_v30  ;;  %v2090_v62 = vpop.f32.mrb[119].mxu1 }
 0x435   :  { %2272 = vst [vmem:[#allocation2 + $0x2c8] sm:$0xff] %v2087_v1  ;;  %v2091_v63 = vadd.f32 %v2090_v62, %v3615_v31 }
 0x436   :  { %2273 = vst [vmem:[#allocation2 + $0x2d0] sm:$0xff] %v2089_v12 }
 0x437   :  { %2274 = vst [vmem:[#allocation2 + $0x2d8] sm:$0xff] %v2091_v63 }
 0x439   :  { %v2094_v14 = vpop.f32.mrb[120].mxu1 }
 0x43a   :  { %v2095_v15 = vadd.f32 %v2094_v14, %v3613_v30  ;;  %v2096_v46 = vpop.f32.mrb[121].mxu1 }
 0x43b   :  { %v2097_v47 = vadd.f32 %v2096_v46, %v3615_v31  ;;  %v2098_v60 = vpop.f32.mrb[122].mxu1 }
 0x43c   :  { %2275 = vst [vmem:[#allocation2 + $0x2e0] sm:$0xff] %v2095_v15  ;;  %v2099_v61 = vadd.f32 %v2098_v60, %v3613_v30  ;;  %v2100_v3 = vpop.f32.mrb[123].mxu1 }
 0x43d   :  { %2276 = vst [vmem:[#allocation2 + $0x2e8] sm:$0xff] %v2097_v47  ;;  %v2101_v5 = vadd.f32 %v2100_v3, %v3615_v31 }
 0x43e   :  { %2277 = vst [vmem:[#allocation2 + $0x2f0] sm:$0xff] %v2099_v61 }
 0x43f   :  { %2278 = vst [vmem:[#allocation2 + $0x2f8] sm:$0xff] %v2101_v5 }
 0x441   :  { %v2104_v6 = vpop.f32.mrb[124].mxu1 }
 0x442   :  { %v2105_v7 = vadd.f32 %v2104_v6, %v3613_v30  ;;  %v2106_v8 = vpop.f32.mrb[125].mxu1 }
 0x443   :  { %v2107_v9 = vadd.f32 %v2106_v8, %v3615_v31  ;;  %v2108_v10 = vpop.f32.mrb[126].mxu1 }
 0x444   :  { %2279 = vst [vmem:[#allocation2 + $0x300] sm:$0xff] %v2105_v7  ;;  %v2109_v11 = vadd.f32 %v2108_v10, %v3613_v30  ;;  %v2110_v13 = vpop.f32.mrb[127].mxu1 }
 0x445   :  { %2280 = vst [vmem:[#allocation2 + $0x308] sm:$0xff] %v2107_v9  ;;  %v2111_v16 = vadd.f32 %v2110_v13, %v3615_v31 }
 0x446   :  { %2281 = vst [vmem:[#allocation2 + $0x310] sm:$0xff] %v2109_v11 }
 0x447   :  { %2282 = vst [vmem:[#allocation2 + $0x318] sm:$0xff] %v2111_v16 }
 0x449   :  { %v2114_v4 = vpop.f32.mrb[128].mxu1 }
 0x44a   :  { %v2115_v34 = vadd.f32 %v2114_v4, %v3613_v30  ;;  %v2116_v17 = vpop.f32.mrb[129].mxu1 }
 0x44b   :  { %v2117_v18 = vadd.f32 %v2116_v17, %v3615_v31  ;;  %v2118_v22 = vpop.f32.mrb[130].mxu1 }
 0x44c   :  { %2283 = vst [vmem:[#allocation2 + $0x320] sm:$0xff] %v2115_v34  ;;  %v2119_v42 = vadd.f32 %v2118_v22, %v3613_v30  ;;  %v2120_v24 = vpop.f32.mrb[131].mxu1 }
 0x44d   :  { %2284 = vst [vmem:[#allocation2 + $0x328] sm:$0xff] %v2117_v18  ;;  %v2121_v25 = vadd.f32 %v2120_v24, %v3615_v31 }
 0x44e   :  { %2285 = vst [vmem:[#allocation2 + $0x330] sm:$0xff] %v2119_v42 }
 0x44f   :  { %2286 = vst [vmem:[#allocation2 + $0x338] sm:$0xff] %v2121_v25 }
 0x451   :  { %v2124_v26 = vpop.f32.mrb[132].mxu1 }
 0x452   :  { %v2125_v27 = vadd.f32 %v2124_v26, %v3613_v30  ;;  %v2126_v28 = vpop.f32.mrb[133].mxu1 }
 0x453   :  { %v2127_v29 = vadd.f32 %v2126_v28, %v3615_v31  ;;  %v2128_v32 = vpop.f32.mrb[134].mxu1 }
 0x454   :  { %2287 = vst [vmem:[#allocation2 + $0x340] sm:$0xff] %v2125_v27  ;;  %v2129_v21 = vadd.f32 %v2128_v32, %v3613_v30  ;;  %v2130_v33 = vpop.f32.mrb[135].mxu1 }
 0x455   :  { %2288 = vst [vmem:[#allocation2 + $0x348] sm:$0xff] %v2127_v29  ;;  %v2131_v50 = vadd.f32 %v2130_v33, %v3615_v31 }
 0x456   :  { %2289 = vst [vmem:[#allocation2 + $0x350] sm:$0xff] %v2129_v21 }
 0x457   :  { %2290 = vst [vmem:[#allocation2 + $0x358] sm:$0xff] %v2131_v50 }
 0x459   :  { %v2134_v36 = vpop.f32.mrb[136].mxu1 }
 0x45a   :  { %v2135_v37 = vadd.f32 %v2134_v36, %v3613_v30  ;;  %v2136_v38 = vpop.f32.mrb[137].mxu1 }
 0x45b   :  { %v2137_v39 = vadd.f32 %v2136_v38, %v3615_v31  ;;  %v2138_v40 = vpop.f32.mrb[138].mxu1 }
 0x45c   :  { %2291 = vst [vmem:[#allocation2 + $0x360] sm:$0xff] %v2135_v37  ;;  %v2139_v41 = vadd.f32 %v2138_v40, %v3613_v30  ;;  %v2140_v43 = vpop.f32.mrb[139].mxu1 }
 0x45d   :  { %2292 = vst [vmem:[#allocation2 + $0x368] sm:$0xff] %v2137_v39  ;;  %v2141_v44 = vadd.f32 %v2140_v43, %v3615_v31 }
 0x45e   :  { %2293 = vst [vmem:[#allocation2 + $0x370] sm:$0xff] %v2139_v41 }
 0x45f   :  { %2294 = vst [vmem:[#allocation2 + $0x378] sm:$0xff] %v2141_v44 }
 0x461   :  { %v2144_v45 = vpop.f32.mrb[140].mxu1 }
 0x462   :  { %v2145_v48 = vadd.f32 %v2144_v45, %v3613_v30  ;;  %v2146_v19 = vpop.f32.mrb[141].mxu1 }
 0x463   :  { %v2147_v20 = vadd.f32 %v2146_v19, %v3615_v31  ;;  %v2148_v51 = vpop.f32.mrb[142].mxu1 }
 0x464   :  { %2295 = vst [vmem:[#allocation2 + $0x380] sm:$0xff] %v2145_v48  ;;  %v2149_v52 = vadd.f32 %v2148_v51, %v3613_v30  ;;  %v2150_v49 = vpop.f32.mrb[143].mxu1 }
 0x465   :  { %2296 = vst [vmem:[#allocation2 + $0x388] sm:$0xff] %v2147_v20  ;;  %v2151_v53 = vadd.f32 %v2150_v49, %v3615_v31 }
 0x466   :  { %2297 = vst [vmem:[#allocation2 + $0x390] sm:$0xff] %v2149_v52 }
 0x467   :  { %2298 = vst [vmem:[#allocation2 + $0x398] sm:$0xff] %v2151_v53 }
 0x469   :  { %v2154_v54 = vpop.f32.mrb[144].mxu1 }
 0x46a   :  { %v2155_v55 = vadd.f32 %v2154_v54, %v3613_v30  ;;  %v2156_v56 = vpop.f32.mrb[145].mxu1 }
 0x46b   :  { %v2157_v23 = vadd.f32 %v2156_v56, %v3615_v31  ;;  %v2158_v57 = vpop.f32.mrb[146].mxu1 }
 0x46c   :  { %2299 = vst [vmem:[#allocation2 + $0x3a0] sm:$0xff] %v2155_v55  ;;  %v2159_v58 = vadd.f32 %v2158_v57, %v3613_v30  ;;  %v2160_v59 = vpop.f32.mrb[147].mxu1 }
 0x46d   :  { %2300 = vst [vmem:[#allocation2 + $0x3a8] sm:$0xff] %v2157_v23  ;;  %v2161_v0 = vadd.f32 %v2160_v59, %v3615_v31 }
 0x46e   :  { %2301 = vst [vmem:[#allocation2 + $0x3b0] sm:$0xff] %v2159_v58 }
 0x46f   :  { %2302 = vst [vmem:[#allocation2 + $0x3b8] sm:$0xff] %v2161_v0 }
 0x471   :  { %v2164_v35 = vpop.f32.mrb[148].mxu1 }
 0x472   :  { %v2165_v1 = vadd.f32 %v2164_v35, %v3613_v30  ;;  %v2166_v2 = vpop.f32.mrb[149].mxu1 }
 0x473   :  { %v2167_v12 = vadd.f32 %v2166_v2, %v3615_v31  ;;  %v2168_v62 = vpop.f32.mrb[150].mxu1 }
 0x474   :  { %2303 = vst [vmem:[#allocation2 + $0x3c0] sm:$0xff] %v2165_v1  ;;  %v2169_v63 = vadd.f32 %v2168_v62, %v3613_v30  ;;  %v2170_v14 = vpop.f32.mrb[151].mxu1 }
 0x475   :  { %2304 = vst [vmem:[#allocation2 + $0x3c8] sm:$0xff] %v2167_v12  ;;  %v2171_v15 = vadd.f32 %v2170_v14, %v3615_v31 }
 0x476   :  { %2305 = vst [vmem:[#allocation2 + $0x3d0] sm:$0xff] %v2169_v63 }
 0x477   :  { %2306 = vst [vmem:[#allocation2 + $0x3d8] sm:$0xff] %v2171_v15 }
 0x479   :  { %v2174_v46 = vpop.f32.mrb[152].mxu1 }
 0x47a   :  { %v2175_v47 = vadd.f32 %v2174_v46, %v3613_v30  ;;  %v2176_v60 = vpop.f32.mrb[153].mxu1 }
 0x47b   :  { %v2177_v61 = vadd.f32 %v2176_v60, %v3615_v31  ;;  %v2178_v3 = vpop.f32.mrb[154].mxu1 }
 0x47c   :  { %2307 = vst [vmem:[#allocation2 + $0x3e0] sm:$0xff] %v2175_v47  ;;  %v2179_v5 = vadd.f32 %v2178_v3, %v3613_v30  ;;  %v2180_v6 = vpop.f32.mrb[155].mxu1 }
 0x47d   :  { %2308 = vst [vmem:[#allocation2 + $0x3e8] sm:$0xff] %v2177_v61  ;;  %v2181_v7 = vadd.f32 %v2180_v6, %v3615_v31 }
 0x47e   :  { %2309 = vst [vmem:[#allocation2 + $0x3f0] sm:$0xff] %v2179_v5 }
 0x47f   :  { %2310 = vst [vmem:[#allocation2 + $0x3f8] sm:$0xff] %v2181_v7 }
 0x480   :  { %2934 = shalt.err (!%p2931_p4)
}
 0x481   :  { %s2935_s16 = scalar_lea.hbm %s3773_s6, 16384 }
 0x482   :  { %p2936_p5 = scmp.ne.s32.totalorder %s3773_s6, %s2935_s16  ;;  %p2939_p6 = scmp.lt.u32.totalorder %s2935_s16, %s3773_s6 }
 0x484   :  { %p2941_p7 = pnand %p2939_p6, %p2936_p5 }
 0x486   :  { %2944 = shalt.err (!%p2941_p7)
}
 0x487   :  { %s2949_s20 = smov 256   ;;  %s2950_s21 = smov 16  }
 0x488   :  { %2322 = dma.vmem_to_hbm [thread:$0]  %s2317_s13, 16384, %s3773_s6, [#allocation3], %s2949_s20, %s2949_s20, %s2950_s21  }
 0x489   :  { %2945 = dma.done.wait [#allocation3], 16384  }
 0x48a   :  { %2946 = vsyncadd [#allocation3], 4294950912 }
 0x48b   :  { %2326 = vsyncpa [#allocation3], 1 }

</bundles_post_ra>
